<compile_context>
chip_gen: v7x
topology: tpu7x:2x2x1
jax: 0.10.0
libtpu: 0.0.40
codegen_flags: <defaults>
</compile_context>

<pallas_src>
import functools

import jax
import jax.numpy as jnp
from jax.experimental import pallas as pl
from jax.experimental.pallas import tpu as pltpu


def _round_up(x, m):
    return ((x + m - 1) // m) * m


def _mlp_kernel(x_ref, w1_ref, b1_ref, w2_ref, b2_ref, o_ref, *,
                mxu_dtype, approximate_gelu):
    # fc1: [tm, Cin] @ [Cin, H] on the MXU (bf16 in, f32 accumulate).
    x = x_ref[...].astype(mxu_dtype)          # no-op when x is already bf16
    h = jnp.dot(x, w1_ref[...], preferred_element_type=jnp.float32)
    h = h + b1_ref[...]                        # bias in f32 (VPU)
    # tanh GELU: one EUP transcendental + a few VPU ops (default).
    # approximate=False keeps nn.GELU's exact erf at ~25 VALU ops/elem.
    h = jax.nn.gelu(h, approximate=approximate_gelu)
    # fc2: [tm, H] @ [H, Cout]
    o = jnp.dot(h.astype(mxu_dtype), w2_ref[...],
                preferred_element_type=jnp.float32)
    o = o + b2_ref[...]                        # bias in f32
    o_ref[...] = o.astype(o_ref.dtype)


@functools.partial(
    jax.jit,
    static_argnames=("tm", "mxu_dtype", "approximate_gelu", "out_dtype"))
def mlp_pallas(x, w1, b1, w2, b2, *, tm=None, mxu_dtype=jnp.bfloat16,
               approximate_gelu=True, out_dtype=None):
    """x: [..., Cin]; w1: [Cin, H]; b1: [H]; w2: [H, Cout]; b2: [Cout]."""
    orig_shape = x.shape
    cin = orig_shape[-1]
    hidden = w1.shape[1]
    cout = w2.shape[1]
    if out_dtype is None:
        out_dtype = x.dtype

    x2d = x.reshape(-1, cin)
    m = x2d.shape[0]

    # ---- Row-tile selection (128-aligned, fills the 256-wide MXU on
    #      v6e/v7x, keeps >= 2 tiles so both v7x TensorCores get work). ----
    m128 = _round_up(max(m, 1), 128)
    if tm is None:
        tm = 512 if m128 >= 2048 else 256
    tm_eff = max(128, _round_up(min(tm, m128), 128))
    if m128 >= 2 * 128:
        tm_eff = min(tm_eff, _round_up(m128 // 2, 128))
    grid_m = pl.cdiv(m, tm_eff)   # no jnp.pad copy: boundary tile is masked

    # Resident weights in the MXU dtype (bf16): half the VMEM / DMA footprint.
    w1_c = w1.astype(mxu_dtype)
    w2_c = w2.astype(mxu_dtype)
    b1_2d = b1.reshape(1, hidden).astype(jnp.float32)
    b2_2d = b2.reshape(1, cout).astype(jnp.float32)

    # ---- Explicit VMEM budget (honest double-buffer accounting), clamped so
    #      the same config stays inside v7x's 64 MiB physical VMEM. ----
    wbytes = (cin * hidden + hidden * cout) * jnp.dtype(mxu_dtype).itemsize
    bbytes = (hidden + cout) * 4
    xbytes = tm_eff * cin * x2d.dtype.itemsize
    obytes = tm_eff * cout * jnp.dtype(out_dtype).itemsize
    hbytes = tm_eff * hidden * 4          # f32 hidden tile + bf16 recast slack
    vmem_bytes = 2 * (wbytes + bbytes + xbytes + obytes) + 2 * hbytes + (4 << 20)
    vmem_bytes = min(int(vmem_bytes), 56 << 20)

    out2d = pl.pallas_call(
        functools.partial(_mlp_kernel, mxu_dtype=mxu_dtype,
                          approximate_gelu=approximate_gelu),
        out_shape=jax.ShapeDtypeStruct((m, cout), out_dtype),
        grid_spec=pltpu.PrefetchScalarGridSpec(
            num_scalar_prefetch=0,
            grid=(grid_m,),
            in_specs=[
                pl.BlockSpec((tm_eff, cin), lambda i: (i, 0)),    # x row tile
                pl.BlockSpec((cin, hidden), lambda i: (0, 0)),    # fc1 W (resident)
                pl.BlockSpec((1, hidden), lambda i: (0, 0)),      # fc1 bias
                pl.BlockSpec((hidden, cout), lambda i: (0, 0)),   # fc2 W (resident)
                pl.BlockSpec((1, cout), lambda i: (0, 0)),        # fc2 bias
            ],
            out_specs=pl.BlockSpec((tm_eff, cout), lambda i: (i, 0)),
        ),
        compiler_params=pltpu.CompilerParams(
            # TODO(synk): verify via trace that "parallel" shards M across the
            # two v7x TensorCores; otherwise switch to pltpu.CORE_PARALLEL.
            dimension_semantics=("parallel",),
            vmem_limit_bytes=vmem_bytes,
        ),
    )(x2d, w1_c, b1_2d, w2_c, b2_2d)

    return out2d.reshape(orig_shape[:-1] + (cout,))


def _init_params(key, in_features, hidden_features, out_features,
                 dtype=jnp.float32):
    """Deterministic init mimicking nn.Linear default (uniform +-1/sqrt(fan_in))."""
    k1, k2, k3, k4 = jax.random.split(key, 4)
    lim1 = 1.0 / (in_features ** 0.5)
    lim2 = 1.0 / (hidden_features ** 0.5)
    # Stored already transposed relative to PyTorch: [in, out] layout.
    w1 = jax.random.uniform(k1, (in_features, hidden_features), dtype, -lim1, lim1)
    b1 = jax.random.uniform(k2, (hidden_features,), dtype, -lim1, lim1)
    w2 = jax.random.uniform(k3, (hidden_features, out_features), dtype, -lim2, lim2)
    b2 = jax.random.uniform(k4, (out_features,), dtype, -lim2, lim2)
    return w1, b1, w2, b2


if __name__ == "__main__":
    key = jax.random.PRNGKey(0)
    kx, kp = jax.random.split(key)

    # Small but lane-dense shapes consistent with the FasterViT Mlp block.
    batch, seq, in_features = 2, 128, 256
    hidden_features = 512
    out_features = in_features  # Mlp default: out_features = in_features

    # bf16 activations end-to-end (halves HBM traffic); params in f32,
    # cast to bf16 once inside the wrapper.
    x = jax.random.normal(kx, (batch, seq, in_features), jnp.float32)
    x = x.astype(jnp.bfloat16)
    w1, b1, w2, b2 = _init_params(kp, in_features, hidden_features, out_features)

    # Auto tile selection: M=256 -> two 128-row tiles (keeps both v7x TCs busy).
    out = mlp_pallas(x, w1, b1, w2, b2)
    out = jax.block_until_ready(out)

    # Reference (plain JAX, f32, same tanh GELU as the kernel default).
    # Kernel uses bf16 activations/weights with f32 accumulation, so compare
    # with a tolerance sized for bf16 rounding.
    xf = x.astype(jnp.float32).reshape(-1, in_features)
    ref = xf @ w1 + b1
    ref = jax.nn.gelu(ref, approximate=True)
    ref = ref @ w2 + b2
    ref = ref.reshape(x.shape[:-1] + (out_features,))

    out_f32 = out.astype(jnp.float32)
    assert out.shape == x.shape[:-1] + (out_features,)
    assert out.dtype == x.dtype
    max_err = float(jnp.max(jnp.abs(out_f32 - ref)))
    assert jnp.allclose(out_f32, ref, atol=4e-2, rtol=4e-2), max_err
    print("KERNEL_OK")
</pallas_src>

<mosaic_0001>
module attributes {stable_mosaic.version = 11 : i64} {
  func.func @_mlp_kernel(%arg0: i32, %arg1: memref<128x256xbf16, #tpu.memory_space<vmem>>, %arg2: memref<256x512xbf16, #tpu.memory_space<vmem>>, %arg3: memref<1x512xf32, #tpu.memory_space<vmem>>, %arg4: memref<512x256xbf16, #tpu.memory_space<vmem>>, %arg5: memref<1x256xf32, #tpu.memory_space<vmem>>, %arg6: memref<128x256xbf16, #tpu.memory_space<vmem>>) attributes {dimension_semantics = [#tpu.dimension_semantics<parallel>], iteration_bounds = array<i64: 2>, scalar_prefetch = 0 : i64, scratch_operands = 0 : i64, tpu.core_type = #tpu.core_type<tc>, window_params = [{transform_indices = @transform_0, window_bounds = array<i64: 128, 256>}, {pipeline_mode = #tpu.pipeline_mode<synchronous>, transform_indices = @transform_1, window_bounds = array<i64: 256, 512>}, {pipeline_mode = #tpu.pipeline_mode<synchronous>, transform_indices = @transform_2, window_bounds = array<i64: 1, 512>}, {pipeline_mode = #tpu.pipeline_mode<synchronous>, transform_indices = @transform_3, window_bounds = array<i64: 512, 256>}, {pipeline_mode = #tpu.pipeline_mode<synchronous>, transform_indices = @transform_4, window_bounds = array<i64: 1, 256>}, {transform_indices = @transform_5, window_bounds = array<i64: 128, 256>}]} {
    %c0 = arith.constant 0 : index
    %c0_0 = arith.constant 0 : index
    %0 = vector.load %arg1[%c0, %c0_0] : memref<128x256xbf16, #tpu.memory_space<vmem>>, vector<128x256xbf16>
    %c0_1 = arith.constant 0 : index
    %c0_2 = arith.constant 0 : index
    %1 = vector.load %arg2[%c0_1, %c0_2] : memref<256x512xbf16, #tpu.memory_space<vmem>>, vector<256x512xbf16>
    %cst = arith.constant dense<0.000000e+00> : vector<128x512xf32>
    %2 = tpu.matmul %0, %1, %cst {dimension_numbers = #tpu.dot_dimension_numbers<[1], [0], [0], [1], [0, 0, 1, 1], [], []>} : vector<128x256xbf16>, vector<256x512xbf16>, vector<128x512xf32> -> vector<128x512xf32>
    %c0_3 = arith.constant 0 : index
    %c0_4 = arith.constant 0 : index
    %3 = vector.load %arg3[%c0_3, %c0_4] : memref<1x512xf32, #tpu.memory_space<vmem>>, vector<1x512xf32>
    %4 = vector.broadcast %3 : vector<1x512xf32> to vector<128x512xf32>
    %5 = arith.addf %2, %4 : vector<128x512xf32>
    %6 = arith.mulf %5, %5 : vector<128x512xf32>
    %7 = arith.mulf %5, %6 : vector<128x512xf32>
    %cst_5 = arith.constant 4.471500e-02 : f32
    %8 = vector.broadcast %cst_5 : f32 to vector<128x512xf32>
    %9 = arith.mulf %8, %7 : vector<128x512xf32>
    %10 = arith.addf %5, %9 : vector<128x512xf32>
    %cst_6 = arith.constant 0.797884583 : f32
    %11 = vector.broadcast %cst_6 : f32 to vector<128x512xf32>
    %12 = arith.mulf %11, %10 : vector<128x512xf32>
    %13 = math.tanh %12 : vector<128x512xf32>
    %cst_7 = arith.constant 1.000000e+00 : f32
    %14 = vector.broadcast %cst_7 : f32 to vector<128x512xf32>
    %15 = arith.addf %14, %13 : vector<128x512xf32>
    %cst_8 = arith.constant 5.000000e-01 : f32
    %16 = vector.broadcast %cst_8 : f32 to vector<128x512xf32>
    %17 = arith.mulf %16, %15 : vector<128x512xf32>
    %18 = arith.mulf %5, %17 : vector<128x512xf32>
    %19 = arith.truncf %18 : vector<128x512xf32> to vector<128x512xbf16>
    %c0_9 = arith.constant 0 : index
    %c0_10 = arith.constant 0 : index
    %20 = vector.load %arg4[%c0_9, %c0_10] : memref<512x256xbf16, #tpu.memory_space<vmem>>, vector<512x256xbf16>
    %cst_11 = arith.constant dense<0.000000e+00> : vector<128x256xf32>
    %21 = tpu.matmul %19, %20, %cst_11 {dimension_numbers = #tpu.dot_dimension_numbers<[1], [0], [0], [1], [0, 0, 1, 1], [], []>} : vector<128x512xbf16>, vector<512x256xbf16>, vector<128x256xf32> -> vector<128x256xf32>
    %c0_12 = arith.constant 0 : index
    %c0_13 = arith.constant 0 : index
    %22 = vector.load %arg5[%c0_12, %c0_13] : memref<1x256xf32, #tpu.memory_space<vmem>>, vector<1x256xf32>
    %23 = vector.broadcast %22 : vector<1x256xf32> to vector<128x256xf32>
    %24 = arith.addf %21, %23 : vector<128x256xf32>
    %25 = arith.truncf %24 : vector<128x256xf32> to vector<128x256xbf16>
    %c0_14 = arith.constant 0 : index
    %c0_15 = arith.constant 0 : index
    %26 = vector.load %arg6[%c0_14, %c0_15] : memref<128x256xbf16, #tpu.memory_space<vmem>>, vector<128x256xbf16>
    tpu.vector_store %arg6[%c0_14, %c0_15], %25 {strides = array<i32>} : memref<128x256xbf16, #tpu.memory_space<vmem>>, vector<128x256xbf16>,
    return
  }
  func.func @transform_0(%arg0: i32) -> (i32, i32) {
    %c0_i32 = arith.constant 0 : i32
    %c0_i32_0 = arith.constant 0 : i32
    return %arg0, %c0_i32 : i32, i32
  }
  func.func @transform_1(%arg0: i32) -> (i32, i32) {
    %c0_i32 = arith.constant 0 : i32
    %c0_i32_0 = arith.constant 0 : i32
    %c0_i32_1 = arith.constant 0 : i32
    return %c0_i32, %c0_i32_0 : i32, i32
  }
  func.func @transform_2(%arg0: i32) -> (i32, i32) {
    %c0_i32 = arith.constant 0 : i32
    %c0_i32_0 = arith.constant 0 : i32
    %c0_i32_1 = arith.constant 0 : i32
    return %c0_i32, %c0_i32_0 : i32, i32
  }
  func.func @transform_3(%arg0: i32) -> (i32, i32) {
    %c0_i32 = arith.constant 0 : i32
    %c0_i32_0 = arith.constant 0 : i32
    %c0_i32_1 = arith.constant 0 : i32
    return %c0_i32, %c0_i32_0 : i32, i32
  }
  func.func @transform_4(%arg0: i32) -> (i32, i32) {
    %c0_i32 = arith.constant 0 : i32
    %c0_i32_0 = arith.constant 0 : i32
    %c0_i32_1 = arith.constant 0 : i32
    return %c0_i32, %c0_i32_0 : i32, i32
  }
  func.func @transform_5(%arg0: i32) -> (i32, i32) {
    %c0_i32 = arith.constant 0 : i32
    %c0_i32_0 = arith.constant 0 : i32
    return %arg0, %c0_i32 : i32, i32
  }
}

</mosaic_0001>

<bundles_post_ra>
// kernel: mlp_pallas.1
= control target key start
LH: loop header
LB: loop body
LE: loop exit
PB: predicated region body
PF: predicated region fallthrough
CT: control target
= control target key end

     0   :  { %10 = vsyncpa [#allocation3], 0  ;;  %s4533_s0 = inlined_call_operand.vmem [shape: bf16[256,256], index: 0, kind: input, shape index: {}]   ;;  %s4534_s1 = inlined_call_operand.vmem [shape: bf16[256,512], index: 1, kind: input, shape index: {}]   ;;  %s4535_s2 = inlined_call_operand.vmem [shape: f32[1,512], index: 2, kind: input, shape index: {}]   ;;  %s4536_s3 = inlined_call_operand.vmem [shape: bf16[512,256], index: 3, kind: input, shape index: {}]   ;;  %s4537_s4 = inlined_call_operand.vmem [shape: f32[1,256], index: 4, kind: input, shape index: {}]   ;;  %s4538_s5 = inlined_call_operand.hbm [shape: bf16[256,256], index: 5, kind: output, shape index: {}]  }
   0x1   :  { %12 = vsyncpa [#allocation3 + $0x1], 0  ;;  %s3115_s18 = smov 0   ;;  %s3117_s19 = smov 0  }
   0x2   :  { %s3119_s20 = smov 0   ;;  %s3121_s21 = smov 0  }
   0x3 LB: > { %s3136_s22 = sadd.s32 4294967295, %s3080_s21   ;;  %s2376_s23 = sadd.s32 4294967294, %s3080_s21   ;;  %s3080_s21 = sphi %s3121_s21, %s4544_s21   ;;  %s3076_s20 = sphi %s3119_s20, %s4543_s20   ;;  %s3072_s19 = sphi %s3117_s19, %s4542_s19   ;;  %s3068_s18 = sphi %s3115_s18, %s4541_s18  }
   0x4   : > { %s3140_s24 = sadd.s32 1, %s3080_s21   ;;  %s135_s25 = sadd.s32 1, %s3076_s20 }
   0x5   : > { %s132_s26 = ssub.s32 %s3080_s21, %s3140_s24  ;;  %p145_p0 = scmp.ne.s32.totalorder %s3076_s20, %s3072_s19 }
   0x6   : > { %p133_p1 = scmp.eq.s32.totalorder %s132_s26, 0  ;;  %p146_p2 = scmp.eq.s32.totalorder %s3136_s22, 1 }
   0x7   : > { %p151_p3 = scmp.ne.s32.totalorder %s3072_s19, %s3068_s18  ;;  %p152_p4 = scmp.eq.s32.totalorder %s2376_s23, 1 }
   0x8   : > { %s3151_s27 = scalar_select %p133_p1, %s3076_s20, %s135_s25  }
   0x9   : > { %p3153_p5 = por %p146_p2, %p145_p0  ;;  %p3157_p6 = por %p152_p4, %p151_p3 }
   0xa   : > { %p2379_p7 = scmp.ge.s32.totalorder %s3080_s21, 1  ;;  %p192_p8 = scmp.lt.s32.totalorder %s3080_s21, 3 }
   0xc   : > { %p193_p9 = pnand %p2379_p7, %p192_p8 }
   0xd   : > { %v2674_v0 = vld [vmem:[%s4534_s1 + $0x4] ss:$16 sps:$4 sm:$0xff] (!%p193_p9)   ;;  %v2676_v1 = vld [vmem:[%s4534_s1] ss:$16 sps:$4 sm:$0xff] (!%p193_p9)   ;;  %s2381_s15 = sshll.u32 (!%p193_p9), %s3136_s22, 4  ;;  %s218_s6 = sand.u32 (!%p193_p9), 1, %s3072_s19  }
   0xe   : > { %196 = sbr.rel (%p193_p9) target bundleno = 717 (0x2cd), region = 40  ;;  %731 = vmatprep.subr.bf16.mxu1 (!%p193_p9), %v2674_v0  ;;  %v2677_v2 = vld [vmem:[%s4534_s1 + $0x24] ss:$16 sps:$4 sm:$0xff] (!%p193_p9)   ;;  %v2679_v3 = vld [vmem:[%s4534_s1 + $0x20] ss:$16 sps:$4 sm:$0xff] (!%p193_p9)   ;;  %p222_p10 = scmp.lt.s32.totalorder (!%p193_p9), %s2381_s15, 31 }
   0xf   : > { %732 = vmatpush1.bf16.msra.mxu1 (!%p193_p9), %v2676_v1  ;;  %v2680_v4 = vld [vmem:[%s4534_s1 + $0x44] ss:$16 sps:$4 sm:$0xff] (!%p193_p9)   ;;  %v2682_v5 = vld [vmem:[%s4534_s1 + $0x40] ss:$16 sps:$4 sm:$0xff] (!%p193_p9)   ;;  %v2727_v36 = vld [vmem:[%s4534_s1 + $0xc] ss:$16 sps:$4 sm:$0xff] (!%p193_p9)  }
  0x10   : > { %733 = vmatprep.subr.bf16.mxu1 (!%p193_p9), %v2677_v2  ;;  %v2683_v6 = vld [vmem:[%s4534_s1 + $0x64] ss:$16 sps:$4 sm:$0xff] (!%p193_p9)   ;;  %v2685_v7 = vld [vmem:[%s4534_s1 + $0x60] ss:$16 sps:$4 sm:$0xff] (!%p193_p9)   ;;  %v2725_v38 = vld [vmem:[%s4534_s1 + $0x8] ss:$16 sps:$4 sm:$0xff] (!%p193_p9)  }
  0x11   : > { %v2686_v8 = vld [vmem:[%s4534_s1 + $0x84] ss:$16 sps:$4 sm:$0xff] (!%p193_p9)   ;;  %v2688_v9 = vld [vmem:[%s4534_s1 + $0x80] ss:$16 sps:$4 sm:$0xff] (!%p193_p9)   ;;  %v2730_v40 = vld [vmem:[%s4534_s1 + $0x2c] ss:$16 sps:$4 sm:$0xff] (!%p193_p9)  }
  0x12   : > { %v2689_v10 = vld [vmem:[%s4534_s1 + $0xa4] ss:$16 sps:$4 sm:$0xff] (!%p193_p9)   ;;  %v2691_v11 = vld [vmem:[%s4534_s1 + $0xa0] ss:$16 sps:$4 sm:$0xff] (!%p193_p9)   ;;  %v2728_v45 = vld [vmem:[%s4534_s1 + $0x28] ss:$16 sps:$4 sm:$0xff] (!%p193_p9)  }
  0x13   : > { %734 = vmatpush1.bf16.msra.mxu1 (!%p193_p9), %v2679_v3  ;;  %v2692_v12 = vld [vmem:[%s4534_s1 + $0xc4] ss:$16 sps:$4 sm:$0xff] (!%p193_p9)   ;;  %v2694_v14 = vld [vmem:[%s4534_s1 + $0xc0] ss:$16 sps:$4 sm:$0xff] (!%p193_p9)   ;;  %v2736_v46 = vld [vmem:[%s4534_s1 + $0x4c] ss:$16 sps:$4 sm:$0xff] (!%p193_p9)  }
  0x14   : > { %735 = vmatprep.subr.bf16.mxu1 (!%p193_p9), %v2680_v4  ;;  %v2695_v15 = vld [vmem:[%s4534_s1 + $0xe4] ss:$16 sps:$4 sm:$0xff] (!%p193_p9)   ;;  %v2697_v16 = vld [vmem:[%s4534_s1 + $0xe0] ss:$16 sps:$4 sm:$0xff] (!%p193_p9)   ;;  %v2734_v50 = vld [vmem:[%s4534_s1 + $0x48] ss:$16 sps:$4 sm:$0xff] (!%p193_p9)  }
  0x15   : > { %s4546_s15 = smov (!%p222_p10, %s2381_s15), 31  ;;  %v2698_v17 = vld [vmem:[%s4534_s1 + $0x104] ss:$16 sps:$4 sm:$0xff]   ;;  %v2700_v18 = vld [vmem:[%s4534_s1 + $0x100] ss:$16 sps:$4 sm:$0xff]   ;;  %s2380_s7 = sshll.u32 %s218_s6, 7 }
  0x16   : > { %s2550_s12 = sshll.u32 %s4546_s15, 3  ;;  %v2701_v19 = vld [vmem:[%s4534_s1 + $0x124] ss:$16 sps:$4 sm:$0xff]   ;;  %v2703_v20 = vld [vmem:[%s4534_s1 + $0x120] ss:$16 sps:$4 sm:$0xff]   ;;  %s4435_s8 = scalar_lea.vmem [#allocation2], %s2380_s7 }
  0x17   : > { %736 = vmatpush1.bf16.msra.mxu1 %v2682_v5  ;;  %s3203_s23 = scalar_lea.vmem %s4533_s0, %s2550_s12  ;;  %v2704_v21 = vld [vmem:[%s4534_s1 + $0x144] ss:$16 sps:$4 sm:$0xff]   ;;  %v2706_v22 = vld [vmem:[%s4534_s1 + $0x140] ss:$16 sps:$4 sm:$0xff]   ;;  %v2739_v52 = vld [vmem:[%s4534_s1 + $0x6c] ss:$16 sps:$4 sm:$0xff]  }
  0x18   : > { %737 = vmatprep.subr.bf16.mxu1 %v2683_v6  ;;  %v3209_v13 = vld [vmem:[%s3203_s23 + $0x4] ss:$8 sps:$4 sm:$0xff]   ;;  %v2709_v24 = vld [vmem:[%s4534_s1 + $0x160] ss:$16 sps:$4 sm:$0xff]   ;;  %v2797_v34 = vld [vmem:[%s4536_s3 + $0x14] ss:$8 sps:$4 sm:$0xff]  }
  0x19   : > { %763 = vmatprep.mubr.bf16.mxu1 %v3209_v13  ;;  %v2707_v23 = vld [vmem:[%s4534_s1 + $0x164] ss:$16 sps:$4 sm:$0xff]   ;;  %v2712_v26 = vld [vmem:[%s4534_s1 + $0x180] ss:$16 sps:$4 sm:$0xff]   ;;  %v2737_v55 = vld [vmem:[%s4534_s1 + $0x68] ss:$16 sps:$4 sm:$0xff]  }
  0x1a   : > { %v2710_v25 = vld [vmem:[%s4534_s1 + $0x184] ss:$16 sps:$4 sm:$0xff]   ;;  %v2715_v28 = vld [vmem:[%s4534_s1 + $0x1a0] ss:$16 sps:$4 sm:$0xff]   ;;  %v2745_v56 = vld [vmem:[%s4534_s1 + $0x8c] ss:$16 sps:$4 sm:$0xff]  }
  0x1b   : > { %738 = vmatpush1.bf16.msra.mxu1 %v2685_v7  ;;  %v2713_v27 = vld [vmem:[%s4534_s1 + $0x1a4] ss:$16 sps:$4 sm:$0xff]   ;;  %v2718_v30 = vld [vmem:[%s4534_s1 + $0x1c0] ss:$16 sps:$4 sm:$0xff]   ;;  %v2743_v60 = vld [vmem:[%s4534_s1 + $0x88] ss:$16 sps:$4 sm:$0xff]  }
  0x1c   : > { %739 = vmatprep.subr.bf16.mxu1 %v2686_v8  ;;  %v2716_v29 = vld [vmem:[%s4534_s1 + $0x1c4] ss:$16 sps:$4 sm:$0xff]   ;;  %v2796_v33 = vld [vmem:[%s4536_s3] ss:$8 sps:$4 sm:$0xff]   ;;  %v2799_v39 = vld [vmem:[%s4536_s3 + $0x10] ss:$8 sps:$4 sm:$0xff]  }
  0x1d   : > { %v2719_v31 = vld [vmem:[%s4534_s1 + $0x1e4] ss:$16 sps:$4 sm:$0xff]   ;;  %v2721_v35 = vld [vmem:[%s4534_s1 + $0x1e0] ss:$16 sps:$4 sm:$0xff]   ;;  %v2748_v62 = vld [vmem:[%s4534_s1 + $0xac] ss:$16 sps:$4 sm:$0xff]  }
  0x1e   : > { %v2794_v32 = vld [vmem:[%s4536_s3 + $0x4] ss:$8 sps:$4 sm:$0xff]   ;;  %v3282_v37 = vld [vmem:[%s3203_s23] ss:$8 sps:$4 sm:$0xff]   ;;  %v3294_v41 = vld [vmem:[%s3203_s23 + $0x14] ss:$8 sps:$4 sm:$0xff]  }
  0x1f   : > { %740 = vmatpush1.bf16.msra.mxu1 %v2688_v9  ;;  %1961 = vmatprep.subr.bf16.mxu0 %v2794_v32  ;;  %v2800_v42 = vld [vmem:[%s4536_s3 + $0x24] ss:$8 sps:$4 sm:$0xff]   ;;  %v2802_v43 = vld [vmem:[%s4536_s3 + $0x20] ss:$8 sps:$4 sm:$0xff]   ;;  %v2803_v44 = vld [vmem:[%s4536_s3 + $0x34] ss:$8 sps:$4 sm:$0xff]  }
  0x20   : > { %741 = vmatprep.subr.bf16.mxu1 %v2689_v10  ;;  %1962 = vmatpush1.bf16.msra.mxu0 %v2796_v33  ;;  %v2805_v47 = vld [vmem:[%s4536_s3 + $0x30] ss:$8 sps:$4 sm:$0xff]   ;;  %v2806_v49 = vld [vmem:[%s4536_s3 + $0x44] ss:$8 sps:$4 sm:$0xff]   ;;  %v2808_v53 = vld [vmem:[%s4536_s3 + $0x40] ss:$8 sps:$4 sm:$0xff]  }
  0x21   : > { %1963 = vmatprep.subr.bf16.mxu0 %v2797_v34  ;;  %v3317_v48 = vld [vmem:[%s3203_s23 + $0x10] ss:$8 sps:$4 sm:$0xff]   ;;  %v3326_v51 = vld [vmem:[%s3203_s23 + $0x24] ss:$8 sps:$4 sm:$0xff]   ;;  %v2809_v54 = vld [vmem:[%s4536_s3 + $0x54] ss:$8 sps:$4 sm:$0xff]  }
  0x22   : > { %v2811_v57 = vld [vmem:[%s4536_s3 + $0x50] ss:$8 sps:$4 sm:$0xff]   ;;  %v3349_v58 = vld [vmem:[%s3203_s23 + $0x20] ss:$8 sps:$4 sm:$0xff]   ;;  %v2812_v59 = vld [vmem:[%s4536_s3 + $0x64] ss:$8 sps:$4 sm:$0xff]  }
  0x23   : > { %742 = vmatpush1.bf16.msra.mxu1 %v2691_v11  ;;  %v3358_v61 = vld [vmem:[%s3203_s23 + $0x34] ss:$8 sps:$4 sm:$0xff]   ;;  %v2814_v63 = vld [vmem:[%s4536_s3 + $0x60] ss:$8 sps:$4 sm:$0xff]   ;;  %v3375_v2 = vld [vmem:[%s3203_s23 + $0x30] ss:$8 sps:$4 sm:$0xff]  }
  0x24   : > { %743 = vmatprep.subr.bf16.mxu1 %v2692_v12  ;;  %1964 = vmatpush1.bf16.msra.mxu0 %v2799_v39  ;;  %v2746_v0 = vld [vmem:[%s4534_s1 + $0xa8] ss:$16 sps:$4 sm:$0xff]   ;;  %v2754_v1 = vld [vmem:[%s4534_s1 + $0xcc] ss:$16 sps:$4 sm:$0xff]   ;;  %s2568_s9 = sshll.u32 %s3136_s22, 11  ;;  %s2314_s10 = sshll.u32 %s4435_s8, 4  ;;  %s4486_s10 = int_to_ptr.vmem [resolvable:$true] %s2314_s10 }
  0x25   : > { %1965 = vmatprep.subr.bf16.mxu0 %v2800_v42  ;;  %v2752_v3 = vld [vmem:[%s4534_s1 + $0xc8] ss:$16 sps:$4 sm:$0xff]   ;;  %v3381_v4 = vld [vmem:[%s3203_s23 + $0x44] ss:$8 sps:$4 sm:$0xff]   ;;  %v3401_v10 = vld [vmem:[%s3203_s23 + $0x54] ss:$8 sps:$4 sm:$0xff]   ;;  %s4484_s13 = scalar_lea.hbm %s4538_s5, %s2568_s9 }
  0x26   : > { %v2757_v5 = vld [vmem:[%s4534_s1 + $0xec] ss:$16 sps:$4 sm:$0xff]   ;;  %v2755_v6 = vld [vmem:[%s4534_s1 + $0xe8] ss:$16 sps:$4 sm:$0xff]   ;;  %s4492_s22 = scalar_lea.sflag [#allocation3], %s218_s6  ;;  %s3082_s14 = smov [#allocation2]  }
  0x27   : > { %744 = vmatpush1.bf16.msra.mxu1 %v2694_v14  ;;  %v2763_v7 = vld [vmem:[%s4534_s1 + $0x10c] ss:$16 sps:$4 sm:$0xff]   ;;  %v3395_v8 = vld [vmem:[%s3203_s23 + $0x40] ss:$8 sps:$4 sm:$0xff]   ;;  %v2829_v39 = vld [vmem:[%s4536_s3 + $0xb0] ss:$8 sps:$4 sm:$0xff]  }
  0x28   : > { %745 = vmatprep.subr.bf16.mxu1 %v2695_v15  ;;  %1966 = vmatpush1.bf16.msra.mxu0 %v2802_v43  ;;  %v2761_v9 = vld [vmem:[%s4534_s1 + $0x108] ss:$16 sps:$4 sm:$0xff]   ;;  %v2766_v11 = vld [vmem:[%s4534_s1 + $0x12c] ss:$16 sps:$4 sm:$0xff]   ;;  %s3022_s16 = sshll.u32 %s3082_s14, 4  ;;  %s3023_s16 = int_to_ptr.vmem [resolvable:$false] %s3022_s16 }
  0x29   : > { %1967 = vmatprep.subr.bf16.mxu0 %v2803_v44  ;;  %v2764_v12 = vld [vmem:[%s4534_s1 + $0x128] ss:$16 sps:$4 sm:$0xff]   ;;  %v2772_v14 = vld [vmem:[%s4534_s1 + $0x14c] ss:$16 sps:$4 sm:$0xff]   ;;  %s3024_s17 = scalar_lea.vmem %s3023_s16, 4096  ;;  %p3025_p0 = scmp.lt.s32.totalorder %s4486_s10, %s3023_s16 }
  0x2a   : > { %v3415_v15 = vld [vmem:[%s3203_s23 + $0x50] ss:$8 sps:$4 sm:$0xff]   ;;  %v2818_v32 = vld [vmem:[%s4536_s3 + $0x84] ss:$8 sps:$4 sm:$0xff]   ;;  %v2820_v33 = vld [vmem:[%s4536_s3 + $0x80] ss:$8 sps:$4 sm:$0xff]  }
  0x2b   : > { %746 = vmatpush1.bf16.msra.mxu1 %v2697_v16  ;;  %v2770_v16 = vld [vmem:[%s4534_s1 + $0x148] ss:$16 sps:$4 sm:$0xff]   ;;  %v2821_v34 = vld [vmem:[%s4536_s3 + $0x94] ss:$8 sps:$4 sm:$0xff]   ;;  %v2836_v44 = vld [vmem:[%s4536_s3 + $0xe4] ss:$8 sps:$4 sm:$0xff]  }
  0x2c   : > { %747 = vmatprep.subr.bf16.mxu1 %v2698_v17  ;;  %1968 = vmatpush1.bf16.msra.mxu0 %v2805_v47  ;;  %v3421_v17 = vld [vmem:[%s3203_s23 + $0x64] ss:$8 sps:$4 sm:$0xff]   ;;  %v2833_v42 = vld [vmem:[%s4536_s3 + $0xd4] ss:$8 sps:$4 sm:$0xff]   ;;  %v2835_v43 = vld [vmem:[%s4536_s3 + $0xd0] ss:$8 sps:$4 sm:$0xff]  }
  0x2d   : > { %1969 = vmatprep.subr.bf16.mxu0 %v2806_v49  ;;  %v2841_v47 = vld [vmem:[%s4536_s3 + $0xf0] ss:$8 sps:$4 sm:$0xff]   ;;  %v311_v49 = vlaneseq }
  0x2f   : > { %748 = vmatpush1.bf16.msra.mxu1 %v2700_v18  ;;  %v2775_v18 = vld [vmem:[%s4534_s1 + $0x16c] ss:$16 sps:$4 sm:$0xff]  }
  0x30   : > { %749 = vmatprep.subr.bf16.mxu1 %v2701_v19  ;;  %1970 = vmatpush1.bf16.msra.mxu0 %v2808_v53  ;;  %v2773_v19 = vld [vmem:[%s4534_s1 + $0x168] ss:$16 sps:$4 sm:$0xff]  }
  0x31   : > { %1971 = vmatprep.subr.bf16.mxu0 %v2809_v54 }
  0x33   : > { %750 = vmatpush1.bf16.msra.mxu1 %v2703_v20  ;;  %v2781_v20 = vld [vmem:[%s4534_s1 + $0x18c] ss:$16 sps:$4 sm:$0xff]  }
  0x34   : > { %751 = vmatprep.subr.bf16.mxu1 %v2704_v21  ;;  %1972 = vmatpush1.bf16.msra.mxu0 %v2811_v57  ;;  %v3435_v21 = vld [vmem:[%s3203_s23 + $0x60] ss:$8 sps:$4 sm:$0xff]  }
  0x35   : > { %1973 = vmatprep.subr.bf16.mxu0 %v2812_v59 }
  0x37   : > { %752 = vmatpush1.bf16.msra.mxu1 %v2706_v22  ;;  %v2779_v22 = vld [vmem:[%s4534_s1 + $0x188] ss:$16 sps:$4 sm:$0xff]  }
  0x38   : > { %753 = vmatprep.subr.bf16.mxu1 %v2707_v23  ;;  %1974 = vmatpush1.bf16.msra.mxu0 %v2814_v63  ;;  %v3441_v23 = vld [vmem:[%s3203_s23 + $0x74] ss:$8 sps:$4 sm:$0xff]  }
  0x3b   : > { %754 = vmatpush1.bf16.msra.mxu1 %v2709_v24  ;;  %v2784_v24 = vld [vmem:[%s4534_s1 + $0x1ac] ss:$16 sps:$4 sm:$0xff]  }
  0x3c   : > { %755 = vmatprep.subr.bf16.mxu1 %v2710_v25  ;;  %v2782_v25 = vld [vmem:[%s4534_s1 + $0x1a8] ss:$16 sps:$4 sm:$0xff]  }
  0x3f   : > { %756 = vmatpush1.bf16.msra.mxu1 %v2712_v26  ;;  %v2790_v26 = vld [vmem:[%s4534_s1 + $0x1cc] ss:$16 sps:$4 sm:$0xff]  }
  0x40   : > { %757 = vmatprep.subr.bf16.mxu1 %v2713_v27  ;;  %v2787_v27 = vld [vmem:[%s3203_s23 + $0x70] ss:$8 sps:$4 sm:$0xff]   ;;  %s3018_s23 = scalar_lea.vmem %s4486_s10, 2048 }
  0x41   : > { %p3019_p11 = scmp.ne.s32.totalorder %s4486_s10, %s3018_s23  ;;  %p3026_p1 = scmp.lt.s32.totalorder %s3024_s17, %s3018_s23 }
  0x43   : > { %758 = vmatpush1.bf16.msra.mxu1 %v2715_v28  ;;  %v2788_v28 = vld [vmem:[%s4534_s1 + $0x1c8] ss:$16 sps:$4 sm:$0xff]   ;;  %p3020_p12 = pnand %p3019_p11, %p3153_p5  ;;  %p3027_p2 = por %p3026_p1, %p3025_p0 }
  0x44   : > { %759 = vmatprep.subr.bf16.mxu1 %v2716_v29  ;;  %v2793_v29 = vld [vmem:[%s4534_s1 + $0x1ec] ss:$16 sps:$4 sm:$0xff]  }
  0x45   : > { %p3021_p13 = pneg %p3020_p12 }
  0x47   : > { %760 = vmatpush1.bf16.msra.mxu1 %v2718_v30  ;;  %v2791_v30 = vld [vmem:[%s4534_s1 + $0x1e8] ss:$16 sps:$4 sm:$0xff]   ;;  %p3028_p3 = pnand %p3027_p2, %p3021_p13 }
  0x48   : > { %761 = vmatprep.subr.bf16.mxu1 %v2719_v31  ;;  %v2815_v31 = vld [vmem:[%s4536_s3 + $0x74] ss:$8 sps:$4 sm:$0xff]  }
  0x49   : > { %1975 = vmatprep.subr.bf16.mxu0 %v2815_v31 }
  0x4b   : > { %762 = vmatpush1.bf16.msra.mxu1 %v2721_v35  ;;  %v2823_v35 = vld [vmem:[%s4536_s3 + $0x90] ss:$8 sps:$4 sm:$0xff]  }
  0x4c   : > { %844 = vmatprep.subr.bf16.mxu1 %v2727_v36  ;;  %v2824_v36 = vld [vmem:[%s4536_s3 + $0xa4] ss:$8 sps:$4 sm:$0xff]  }
  0x4e   : > { %764 = vmatmul.mubr.bf16.vlgmr.msra.gmra.mrb[0].mxu1 %v3282_v37 }
  0x4f   : > { %845 = vmatpush1.bf16.msra.mxu1 %v2725_v38  ;;  %773 = vmatprep.mubr.bf16.mxu1 %v3294_v41  ;;  %v2827_v38 = vld [vmem:[%s4536_s3 + $0xb4] ss:$8 sps:$4 sm:$0xff]  }
  0x50   : > { %846 = vmatprep.subr.bf16.mxu1 %v2730_v40  ;;  %v2830_v40 = vld [vmem:[%s4536_s3 + $0xc4] ss:$8 sps:$4 sm:$0xff]  }
  0x53   : > { %847 = vmatpush1.bf16.msra.mxu1 %v2728_v45  ;;  %v2838_v45 = vld [vmem:[%s4536_s3 + $0xe0] ss:$8 sps:$4 sm:$0xff]  }
  0x54   : > { %848 = vmatprep.subr.bf16.mxu1 %v2736_v46  ;;  %v2839_v46 = vld [vmem:[%s4536_s3 + $0xf4] ss:$8 sps:$4 sm:$0xff]  }
  0x56   : > { %774 = vmatmul.mubr.bf16.gmra.mrb[4].mxu1 %v3317_v48 }
  0x57   : > { %849 = vmatpush1.bf16.msra.mxu1 %v2734_v50  ;;  %783 = vmatprep.mubr.bf16.mxu1 %v3326_v51  ;;  %v3536_v50 = vshrl.u32 %v311_v49, 7 }
  0x58   : > { %850 = vmatprep.subr.bf16.mxu1 %v2739_v52  ;;  %v3542_v52 = vld [vmem:[%s4535_s2] sm:$0xf] }
  0x59   : > { %v317_v53 = vsub.s32 1, %v3536_v50 }
  0x5b   : > { %851 = vmatpush1.bf16.msra.mxu1 %v2737_v55  ;;  %v3553_v55 = vrot.slane %v3542_v52, %v317_v53 }
  0x5c   : > { %852 = vmatprep.subr.bf16.mxu1 %v2745_v56 }
  0x5e   : > { %784 = vmatmul.mubr.bf16.gmra.mrb[8].mxu1 %v3349_v58 }
  0x5f   : > { %853 = vmatpush1.bf16.msra.mxu1 %v2743_v60  ;;  %793 = vmatprep.mubr.bf16.mxu1 %v3358_v61 }
  0x60   : > { %854 = vmatprep.subr.bf16.mxu1 %v2748_v62 }
  0x63   : > { %855 = vmatpush1.bf16.msra.mxu1 %v2746_v0 }
  0x64   : > { %856 = vmatprep.subr.bf16.mxu1 %v2754_v1 }
  0x66   : > { %794 = vmatmul.mubr.bf16.gmra.mrb[12].mxu1 %v3375_v2 }
  0x67   : > { %857 = vmatpush1.bf16.msra.mxu1 %v2752_v3  ;;  %803 = vmatprep.mubr.bf16.mxu1 %v3381_v4 }
  0x68   : > { %858 = vmatprep.subr.bf16.mxu1 %v2757_v5 }
  0x6b   : > { %859 = vmatpush1.bf16.msra.mxu1 %v2755_v6 }
  0x6c   : > { %860 = vmatprep.subr.bf16.mxu1 %v2763_v7 }
  0x6e   : > { %804 = vmatmul.mubr.bf16.gmra.mrb[16].mxu1 %v3395_v8 }
  0x6f   : > { %861 = vmatpush1.bf16.msra.mxu1 %v2761_v9  ;;  %813 = vmatprep.mubr.bf16.mxu1 %v3401_v10 }
  0x70   : > { %862 = vmatprep.subr.bf16.mxu1 %v2766_v11 }
  0x73   : > { %863 = vmatpush1.bf16.msra.mxu1 %v2764_v12 }
  0x74   : > { %864 = vmatprep.subr.bf16.mxu1 %v2772_v14 }
  0x76   : > { %814 = vmatmul.mubr.bf16.gmra.mrb[20].mxu1 %v3415_v15 }
  0x77   : > { %865 = vmatpush1.bf16.msra.mxu1 %v2770_v16  ;;  %823 = vmatprep.mubr.bf16.mxu1 %v3421_v17 }
  0x78   : > { %866 = vmatprep.subr.bf16.mxu1 %v2775_v18 }
  0x7b   : > { %867 = vmatpush1.bf16.msra.mxu1 %v2773_v19 }
  0x7c   : > { %868 = vmatprep.subr.bf16.mxu1 %v2781_v20  ;;  %v321_v20 = vsub.s32 2, %v3536_v50 }
  0x7e   : > { %824 = vmatmul.mubr.bf16.gmra.mrb[24].mxu1 %v3435_v21 }
  0x7f   : > { %869 = vmatpush1.bf16.msra.mxu1 %v2779_v22  ;;  %833 = vmatprep.mubr.bf16.mxu1 %v3441_v23 }
  0x80   : > { %870 = vmatprep.subr.bf16.mxu1 %v2784_v24 }
  0x83   : > { %871 = vmatpush1.bf16.msra.mxu1 %v2782_v25 }
  0x84   : > { %872 = vmatprep.subr.bf16.mxu1 %v2790_v26 }
  0x86   : > { %834 = vmatmul.mubr.bf16.gmra.mrb[28].mxu1 %v2787_v27 }
  0x87   : > { %873 = vmatpush1.bf16.msra.mxu1 %v2788_v28  ;;  %876 = vmatprep.mubr.bf16.mxu1 %v3209_v13  ;;  %v2817_v13 = vld [vmem:[%s4536_s3 + $0x70] ss:$8 sps:$4 sm:$0xff]  }
  0x88   : > { %874 = vmatprep.subr.bf16.mxu1 %v2793_v29  ;;  %1976 = vmatpush1.bf16.msra.mxu0 %v2817_v13 }
  0x89   : > { %1977 = vmatprep.subr.bf16.mxu0 %v2818_v32 }
  0x8b   : > { %875 = vmatpush1.bf16.msra.mxu1 %v2791_v30 }
  0x8c   : > { %1978 = vmatpush1.bf16.msra.mxu0 %v2820_v33 }
  0x8d   : > { %1979 = vmatprep.subr.bf16.mxu0 %v2821_v34 }
  0x8e   : > { %877 = vmatmul.mubr.bf16.vlgmr.msra.gmra.mrb[32].mxu1 %v3282_v37  ;;  %v2826_v37 = vld [vmem:[%s4536_s3 + $0xa0] ss:$8 sps:$4 sm:$0xff]  }
  0x8f   : > { %886 = vmatprep.mubr.bf16.mxu1 %v3294_v41  ;;  %v2832_v41 = vld [vmem:[%s4536_s3 + $0xc0] ss:$8 sps:$4 sm:$0xff]  }
  0x90   : > { %1980 = vmatpush1.bf16.msra.mxu0 %v2823_v35 }
  0x91   : > { %1981 = vmatprep.subr.bf16.mxu0 %v2824_v36 }
  0x94   : > { %1982 = vmatpush1.bf16.msra.mxu0 %v2826_v37 }
  0x95   : > { %1983 = vmatprep.subr.bf16.mxu0 %v2827_v38 }
  0x96   : > { %887 = vmatmul.mubr.bf16.gmra.mrb[36].mxu1 %v3317_v48  ;;  %v2844_v48 = vld [vmem:[%s4536_s3 + $0x104] ss:$8 sps:$4 sm:$0xff]  }
  0x97   : > { %896 = vmatprep.mubr.bf16.mxu1 %v3326_v51  ;;  %v313_v51 = vsub.s32 0, %v3536_v50 }
  0x98   : > { %1984 = vmatpush1.bf16.msra.mxu0 %v2829_v39 }
  0x99   : > { %1985 = vmatprep.subr.bf16.mxu0 %v2830_v40  ;;  %v3548_v54 = vrot.slane %v3542_v52, %v313_v51  ;;  %v3609_v40 = vrot.slane %v3542_v52, %v321_v20 }
  0x9c   : > { %1986 = vmatpush1.bf16.msra.mxu0 %v2832_v41 }
  0x9d   : > { %1987 = vmatprep.subr.bf16.mxu0 %v2833_v42 }
  0x9e   : > { %897 = vmatmul.mubr.bf16.gmra.mrb[40].mxu1 %v3349_v58 }
  0x9f   : > { %906 = vmatprep.mubr.bf16.mxu1 %v3358_v61 }
  0xa0   : > { %1988 = vmatpush1.bf16.msra.mxu0 %v2835_v43 }
  0xa1   : > { %1989 = vmatprep.subr.bf16.mxu0 %v2836_v44 }
  0xa4   : > { %1990 = vmatpush1.bf16.msra.mxu0 %v2838_v45  ;;  %v325_v45 = vsub.s32 3, %v3536_v50 }
  0xa5   : > { %1991 = vmatprep.subr.bf16.mxu0 %v2839_v46 }
  0xa6   : > { %907 = vmatmul.mubr.bf16.gmra.mrb[44].mxu1 %v3375_v2 }
  0xa7   : > { %916 = vmatprep.mubr.bf16.mxu1 %v3381_v4 }
  0xa8   : > { %1992 = vmatpush1.bf16.msra.mxu0 %v2841_v47 }
  0xa9   : > { %2074 = vmatprep.subr.bf16.mxu0 %v2844_v48 }
  0xae   : > { %917 = vmatmul.mubr.bf16.gmra.mrb[48].mxu1 %v3395_v8 }
  0xaf   : > { %926 = vmatprep.mubr.bf16.mxu1 %v3401_v10 }
  0xb6   : > { %927 = vmatmul.mubr.bf16.gmra.mrb[52].mxu1 %v3415_v15 }
  0xb7   : > { %936 = vmatprep.mubr.bf16.mxu1 %v3421_v17 }
  0xbe   : > { %937 = vmatmul.mubr.bf16.gmra.mrb[56].mxu1 %v3435_v21 }
  0xbf   : > { %946 = vmatprep.mubr.bf16.mxu1 %v3441_v23 }
  0xc6   : > { %947 = vmatmul.mubr.bf16.gmra.mrb[60].mxu1 %v2787_v27 }
 0x121   : > { %v765_v56 = vpop.f32.mrb[0].mxu1 }
 0x122   : > { %v3556_v57 = vadd.f32 %v765_v56, %v3548_v54  ;;  %v767_v58 = vpop.f32.mrb[1].mxu1 }
 0x123   : > { %v3559_v59 = vadd.f32 %v767_v58, %v3553_v55  ;;  %v769_v60 = vpop.f32.mrb[2].mxu1 }
 0x124   : > { %v957_v61 = vmul.f32 %v3556_v57, %v3556_v57  ;;  %v3564_v62 = vadd.f32 %v769_v60, %v3548_v54  ;;  %v771_v63 = vpop.f32.mrb[3].mxu1 }
 0x125   : > { %v958_v0 = vmul.f32 %v3559_v59, %v3559_v59  ;;  %v3569_v1 = vadd.f32 %v771_v63, %v3553_v55 }
 0x126   : > { %v1021_v2 = vmul.f32 %v957_v61, %v3556_v57  ;;  %v961_v3 = vmul.f32 %v3564_v62, %v3564_v62 }
 0x127   : > { %v1022_v4 = vmul.f32 %v958_v0, %v3559_v59  ;;  %v962_v5 = vmul.f32 %v3569_v1, %v3569_v1 }
 0x128   : > { %v1085_v6 = vmul.f32 0.044715, %v1021_v2  ;;  %v1025_v7 = vmul.f32 %v961_v3, %v3564_v62 }
 0x129   : > { %v1086_v8 = vmul.f32 0.044715, %v1022_v4  ;;  %v1026_v9 = vmul.f32 %v962_v5, %v3569_v1  ;;  %v775_v10 = vpop.f32.mrb[4].mxu1 }
 0x12a   : > { %v1149_v11 = vadd.f32 %v1085_v6, %v3556_v57  ;;  %v1089_v12 = vmul.f32 0.044715, %v1025_v7  ;;  %v3581_v14 = vadd.f32 %v775_v10, %v3548_v54  ;;  %v777_v15 = vpop.f32.mrb[5].mxu1 }
 0x12b   : > { %v1090_v16 = vmul.f32 0.044715, %v1026_v9  ;;  %v3584_v17 = vadd.f32 %v777_v15, %v3553_v55  ;;  %v779_v18 = vpop.f32.mrb[6].mxu1  ;;  %v1150_v19 = vadd.f32 %v1086_v8, %v3559_v59 }
 0x12c   : > { %v1213_v21 = vmul.f32 0.7978846, %v1149_v11  ;;  %v1153_v22 = vadd.f32 %v1089_v12, %v3564_v62  ;;  %v965_v23 = vmul.f32 %v3581_v14, %v3581_v14  ;;  %v3592_v24 = vadd.f32 %v779_v18, %v3548_v54  ;;  %v781_v25 = vpop.f32.mrb[7].mxu1 }
 0x12d   : > { %v966_v26 = vmul.f32 %v3584_v17, %v3584_v17  ;;  %v3597_v27 = vadd.f32 %v781_v25, %v3553_v55  ;;  %v1154_v28 = vadd.f32 %v1090_v16, %v3569_v1  ;;  %v1214_v29 = vmul.f32 0.7978846, %v1150_v19 }
 0x12e   : > { %2890 = vtanh.f32 %v1213_v21  ;;  %v1217_v30 = vmul.f32 0.7978846, %v1153_v22  ;;  %v1029_v31 = vmul.f32 %v965_v23, %v3581_v14  ;;  %v969_v13 = vmul.f32 %v3592_v24, %v3592_v24 }
 0x12f   : > { %v1030_v32 = vmul.f32 %v966_v26, %v3584_v17  ;;  %v970_v33 = vmul.f32 %v3597_v27, %v3597_v27  ;;  %v1218_v34 = vmul.f32 0.7978846, %v1154_v28  ;;  %2892 = vtanh.f32 %v1214_v29 }
 0x130   : > { %2894 = vtanh.f32 %v1217_v30  ;;  %v1093_v35 = vmul.f32 0.044715, %v1029_v31  ;;  %v1033_v36 = vmul.f32 %v969_v13, %v3592_v24  ;;  %v3640_v16 = vrot.slane %v3542_v52, %v325_v45 }
 0x131   : > { %v1094_v37 = vmul.f32 0.044715, %v1030_v32  ;;  %v1034_v38 = vmul.f32 %v970_v33, %v3597_v27  ;;  %v785_v39 = vpop.f32.mrb[8].mxu1  ;;  %2896 = vtanh.f32 %v1218_v34 }
 0x132   : > { %v1157_v41 = vadd.f32 %v1093_v35, %v3581_v14  ;;  %v1097_v42 = vmul.f32 0.044715, %v1033_v36  ;;  %v3613_v43 = vadd.f32 %v785_v39, %v3548_v54  ;;  %v787_v44 = vpop.f32.mrb[9].mxu1 }
 0x133   : > { %v1158_v46 = vadd.f32 %v1094_v37, %v3584_v17  ;;  %v1098_v47 = vmul.f32 0.044715, %v1034_v38  ;;  %v3618_v48 = vadd.f32 %v787_v44, %v3553_v55  ;;  %v789_v49 = vpop.f32.mrb[10].mxu1 }
 0x134   : > { %v1221_v56 = vmul.f32 0.7978846, %v1157_v41  ;;  %v1161_v58 = vadd.f32 %v1097_v42, %v3592_v24  ;;  %v973_v60 = vmul.f32 %v3613_v43, %v3613_v43  ;;  %v3624_v61 = vadd.f32 %v789_v49, %v3548_v54  ;;  %v791_v63 = vpop.f32.mrb[11].mxu1 }
 0x135   : > { %v1222_v0 = vmul.f32 0.7978846, %v1158_v46  ;;  %v1162_v2 = vadd.f32 %v1098_v47, %v3597_v27  ;;  %v974_v3 = vmul.f32 %v3618_v48, %v3618_v48  ;;  %v3630_v4 = vadd.f32 %v791_v63, %v3553_v55 }
 0x136   : > { %2898 = vtanh.f32 %v1221_v56  ;;  %v1225_v5 = vmul.f32 0.7978846, %v1161_v58  ;;  %v1037_v6 = vmul.f32 %v973_v60, %v3613_v43  ;;  %v977_v7 = vmul.f32 %v3624_v61, %v3624_v61 }
 0x137   : > { %2900 = vtanh.f32 %v1222_v0  ;;  %v1226_v8 = vmul.f32 0.7978846, %v1162_v2  ;;  %v1038_v9 = vmul.f32 %v974_v3, %v3618_v48  ;;  %v978_v10 = vmul.f32 %v3630_v4, %v3630_v4 }
 0x138   : > { %v2891_v11 = vpop.eup %2890  ;;  %2902 = vtanh.f32 %v1225_v5  ;;  %v1101_v12 = vmul.f32 0.044715, %v1037_v6  ;;  %v1041_v15 = vmul.f32 %v977_v7, %v3624_v61 }
 0x139   : > { %v2893_v18 = vpop.eup %2892  ;;  %2904 = vtanh.f32 %v1226_v8  ;;  %v1102_v19 = vmul.f32 0.044715, %v1038_v9  ;;  %v1042_v20 = vmul.f32 %v978_v10, %v3630_v4  ;;  %v795_v21 = vpop.f32.mrb[12].mxu1  ;;  %v3643_v22 = vadd.f32 1.0, %v2891_v11 }
 0x13a   : > { %v2895_v23 = vpop.eup %2894  ;;  %v1165_v25 = vadd.f32 %v1101_v12, %v3613_v43  ;;  %v1105_v26 = vmul.f32 0.044715, %v1041_v15  ;;  %v3647_v28 = vadd.f32 %v795_v21, %v3548_v54  ;;  %v797_v29 = vpop.f32.mrb[13].mxu1  ;;  %v1342_v30 = vadd.f32 1.0, %v2893_v18 }
 0x13b   : > { %v1166_v52 = vadd.f32 %v1102_v19, %v3618_v48  ;;  %v1106_v31 = vmul.f32 0.044715, %v1042_v20  ;;  %v3651_v13 = vadd.f32 %v797_v29, %v3553_v55  ;;  %v799_v32 = vpop.f32.mrb[14].mxu1  ;;  %v3653_v33 = vadd.f32 1.0, %v2895_v23  ;;  %v2897_v39 = vpop.eup %2896 }
 0x13c   : > { %v1229_v34 = vmul.f32 0.7978846, %v1165_v25  ;;  %v1169_v35 = vadd.f32 %v1105_v26, %v3624_v61  ;;  %v981_v36 = vmul.f32 %v3647_v28, %v3647_v28  ;;  %v3659_v37 = vadd.f32 %v799_v32, %v3548_v54  ;;  %v801_v38 = vpop.f32.mrb[15].mxu1 }
 0x13d   : > { %v1230_v41 = vmul.f32 0.7978846, %v1166_v52  ;;  %v1170_v42 = vadd.f32 %v1106_v31, %v3630_v4  ;;  %v982_v44 = vmul.f32 %v3651_v13, %v3651_v13  ;;  %v3665_v45 = vadd.f32 %v801_v38, %v3553_v55 }
 0x13e   : > { %2906 = vtanh.f32 %v1229_v34  ;;  %v1233_v46 = vmul.f32 0.7978846, %v1169_v35  ;;  %v1045_v47 = vmul.f32 %v981_v36, %v3647_v28  ;;  %v985_v49 = vmul.f32 %v3659_v37, %v3659_v37 }
 0x13f   : > { %2908 = vtanh.f32 %v1230_v41  ;;  %v1234_v56 = vmul.f32 0.7978846, %v1170_v42  ;;  %v1046_v58 = vmul.f32 %v982_v44, %v3651_v13  ;;  %v986_v60 = vmul.f32 %v3665_v45, %v3665_v45 }
 0x140   : > { %v3673_v63 = vpop.eup %2898  ;;  %2910 = vtanh.f32 %v1233_v46  ;;  %v1109_v0 = vmul.f32 0.044715, %v1045_v47  ;;  %v1049_v2 = vmul.f32 %v985_v49, %v3659_v37  ;;  %v1346_v3 = vadd.f32 1.0, %v2897_v39 }
 0x141   : > { %v3676_v5 = vpop.eup %2900  ;;  %2912 = vtanh.f32 %v1234_v56  ;;  %v1110_v6 = vmul.f32 0.044715, %v1046_v58  ;;  %v1050_v7 = vmul.f32 %v986_v60, %v3665_v45  ;;  %v805_v8 = vpop.f32.mrb[16].mxu1  ;;  %v1406_v9 = vmul.f32 0.5, %v1342_v30 }
 0x142   : > { %v3679_v10 = vpop.eup %2902  ;;  %v1173_v11 = vadd.f32 %v1109_v0, %v3647_v28  ;;  %v1113_v12 = vmul.f32 0.044715, %v1049_v2  ;;  %v3683_v15 = vadd.f32 %v805_v8, %v3548_v54  ;;  %v807_v18 = vpop.f32.mrb[17].mxu1  ;;  %v1410_v19 = vmul.f32 0.5, %v1346_v3 }
 0x143   : > { %v3685_v20 = vpop.eup %2904  ;;  %v1174_v21 = vadd.f32 %v1110_v6, %v3651_v13  ;;  %v1114_v23 = vmul.f32 0.044715, %v1050_v7  ;;  %v3689_v25 = vadd.f32 %v807_v18, %v3553_v55  ;;  %v809_v26 = vpop.f32.mrb[18].mxu1  ;;  %v1470_v29 = vmul.f32 %v1406_v9, %v3559_v59 }
 0x144   : > { %v1237_v30 = vmul.f32 0.7978846, %v1173_v11  ;;  %v1177_v52 = vadd.f32 %v1113_v12, %v3659_v37  ;;  %v989_v31 = vmul.f32 %v3683_v15, %v3683_v15  ;;  %v3696_v32 = vadd.f32 %v809_v26, %v3548_v54  ;;  %v811_v34 = vpop.f32.mrb[19].mxu1 }
 0x145   : > { %v1238_v35 = vmul.f32 0.7978846, %v1174_v21  ;;  %v1178_v36 = vadd.f32 %v1114_v23, %v3665_v45  ;;  %v990_v38 = vmul.f32 %v3689_v25, %v3689_v25  ;;  %v3702_v39 = vadd.f32 %v811_v34, %v3553_v55 }
 0x146   : > { %2914 = vtanh.f32 %v1237_v30  ;;  %v1241_v59 = vmul.f32 0.7978846, %v1177_v52  ;;  %v1053_v41 = vmul.f32 %v989_v31, %v3683_v15  ;;  %v993_v42 = vmul.f32 %v3696_v32, %v3696_v32 }
 0x147   : > { %2916 = vtanh.f32 %v1238_v35  ;;  %v1242_v44 = vmul.f32 0.7978846, %v1178_v36  ;;  %v1054_v46 = vmul.f32 %v990_v38, %v3689_v25  ;;  %v994_v47 = vmul.f32 %v3702_v39, %v3702_v39 }
 0x148   : > { %v3710_v49 = vpop.eup %2906  ;;  %2918 = vtanh.f32 %v1241_v59  ;;  %v1117_v56 = vmul.f32 0.044715, %v1053_v41  ;;  %v1057_v58 = vmul.f32 %v993_v42, %v3696_v32  ;;  %v1474_v60 = vmul.f32 %v1410_v19, %v3569_v1  ;;  %v2847_v42 = vld [vmem:[%s4536_s3 + $0x114] ss:$8 sps:$4 sm:$0xff]  }
 0x149   : > { %v3714_v0 = vpop.eup %2908  ;;  %2920 = vtanh.f32 %v1242_v44  ;;  %v1118_v2 = vmul.f32 0.044715, %v1054_v46  ;;  %v1058_v3 = vmul.f32 %v994_v47, %v3702_v39  ;;  %v1405_v6 = vmul.f32 0.5, %v3643_v22  ;;  %v815_v7 = vpop.f32.mrb[20].mxu1 }
 0x14a   : > { %v3718_v8 = vpop.eup %2910  ;;  %v1181_v9 = vadd.f32 %v1117_v56, %v3683_v15  ;;  %v1121_v11 = vmul.f32 0.044715, %v1057_v58  ;;  %v1534_v12 = vpack.c.bf16 %v1474_v60, %v1470_v29  ;;  %v1409_v18 = vmul.f32 0.5, %v3653_v33  ;;  %v817_v21 = vpop.f32.mrb[21].mxu1  ;;  %v2845_v60 = vld [vmem:[%s4536_s3 + $0x110] ss:$8 sps:$4 sm:$0xff]  }
 0x14b   : > { %v3722_v23 = vpop.eup %2912  ;;  %v1182_v1 = vadd.f32 %v1118_v2, %v3689_v25  ;;  %v1122_v19 = vmul.f32 0.044715, %v1058_v3  ;;  %v1469_v26 = vmul.f32 %v1405_v6, %v3556_v57  ;;  %v3727_v30 = vadd.f32 %v815_v7, %v3548_v54  ;;  %v819_v22 = vpop.f32.mrb[22].mxu1  ;;  %v2842_v57 = vld [vmem:[%s4536_s3 + $0x100] ss:$8 sps:$4 sm:$0xff]  }
 0x14c   : > { %v1245_v52 = vmul.f32 0.7978846, %v1181_v9  ;;  %v1185_v31 = vadd.f32 %v1121_v11, %v3696_v32  ;;  %1993 = vmatprep.mubr.bf16.mxu0 %v1534_v12  ;;  %v1473_v29 = vmul.f32 %v1409_v18, %v3564_v62  ;;  %v3732_v33 = vadd.f32 %v817_v21, %v3553_v55  ;;  %v821_v34 = vpop.f32.mrb[23].mxu1  ;;  %v2850_v18 = vld [vmem:[%s4536_s3 + $0x124] ss:$8 sps:$4 sm:$0xff]  }
 0x14d   : > { %v1246_v35 = vmul.f32 0.7978846, %v1182_v1  ;;  %v1186_v36 = vadd.f32 %v1122_v19, %v3702_v39  ;;  %v997_v38 = vmul.f32 %v3727_v30, %v3727_v30  ;;  %v3741_v59 = vadd.f32 %v819_v22, %v3548_v54 }
 0x14e   : > { %2922 = vtanh.f32 %v1245_v52  ;;  %v1249_v41 = vmul.f32 0.7978846, %v1185_v31  ;;  %v1533_v62 = vpack.c.bf16 %v1473_v29, %v1469_v26  ;;  %v998_v44 = vmul.f32 %v3732_v33, %v3732_v33 }
 0x14f   : > { %2924 = vtanh.f32 %v1246_v35  ;;  %v1250_v46 = vmul.f32 0.7978846, %v1186_v36  ;;  %v1061_v47 = vmul.f32 %v997_v38, %v3727_v30  ;;  %v1001_v56 = vmul.f32 %v3741_v59, %v3741_v59 }
 0x150   : > { %v3751_v58 = vpop.eup %2914  ;;  %2926 = vtanh.f32 %v1249_v41  ;;  %1994 = vmatmul.mubr.bf16.vlgmr.msra.gmra.mrb[0].mxu0 %v1533_v62  ;;  %v1062_v2 = vmul.f32 %v998_v44, %v3732_v33  ;;  %v3758_v3 = vadd.f32 %v821_v34, %v3553_v55  ;;  %v1350_v6 = vadd.f32 1.0, %v3676_v5 }
 0x151   : > { %v3761_v7 = vpop.eup %2916  ;;  %2928 = vtanh.f32 %v1250_v46  ;;  %2075 = vmatpush1.bf16.msra.mxu0 %v2842_v57  ;;  %v1125_v9 = vmul.f32 0.044715, %v1061_v47  ;;  %v1065_v11 = vmul.f32 %v1001_v56, %v3741_v59  ;;  %v1354_v12 = vadd.f32 1.0, %v3685_v20  ;;  %v825_v21 = vpop.f32.mrb[24].mxu1 }
 0x152   : > { %v3768_v1 = vpop.eup %2918  ;;  %2076 = vmatprep.subr.bf16.mxu0 %v2847_v42  ;;  %v1126_v19 = vmul.f32 0.044715, %v1062_v2  ;;  %v1002_v5 = vmul.f32 %v3758_v3, %v3758_v3  ;;  %v1414_v26 = vmul.f32 0.5, %v1350_v6  ;;  %v1349_v22 = vadd.f32 1.0, %v3673_v63  ;;  %v827_v52 = vpop.f32.mrb[25].mxu1 }
 0x153   : > { %v3773_v31 = vpop.eup %2920  ;;  %v1189_v20 = vadd.f32 %v1125_v9, %v3727_v30  ;;  %v1129_v29 = vmul.f32 0.044715, %v1065_v11  ;;  %v1418_v34 = vmul.f32 0.5, %v1354_v12  ;;  %v1353_v35 = vadd.f32 1.0, %v3679_v10  ;;  %v829_v36 = vpop.f32.mrb[26].mxu1 }
 0x154   : > { %v1190_v57 = vadd.f32 %v1126_v19, %v3732_v33  ;;  %v1066_v38 = vmul.f32 %v1002_v5, %v3758_v3  ;;  %v1478_v41 = vmul.f32 %v1414_v26, %v3584_v17  ;;  %v1413_v62 = vmul.f32 0.5, %v1349_v22  ;;  %v831_v42 = vpop.f32.mrb[27].mxu1  ;;  %v2848_v10 = vld [vmem:[%s4536_s3 + $0x120] ss:$8 sps:$4 sm:$0xff]  }
 0x155   : > { %v1253_v44 = vmul.f32 0.7978846, %v1189_v20  ;;  %2077 = vmatpush1.bf16.msra.mxu0 %v2845_v60  ;;  %v1193_v63 = vadd.f32 %v1129_v29, %v3741_v59  ;;  %v1482_v46 = vmul.f32 %v1418_v34, %v3597_v27  ;;  %v1417_v47 = vmul.f32 0.5, %v1353_v35  ;;  %v2853_v60 = vld [vmem:[%s4536_s3 + $0x134] ss:$8 sps:$4 sm:$0xff]  }
 0x156   : > { %v1254_v56 = vmul.f32 0.7978846, %v1190_v57  ;;  %v1130_v2 = vmul.f32 0.044715, %v1066_v38  ;;  %v1477_v6 = vmul.f32 %v1413_v62, %v3581_v14  ;;  %2078 = vmatprep.subr.bf16.mxu0 %v2850_v18  ;;  %v3787_v17 = vadd.f32 %v825_v21, %v3548_v54 }
 0x157   : > { %2930 = vtanh.f32 %v1253_v44  ;;  %v1257_v9 = vmul.f32 0.7978846, %v1193_v63  ;;  %v1538_v27 = vpack.c.bf16 %v1482_v46, %v1478_v41  ;;  %v1481_v11 = vmul.f32 %v1417_v47, %v3592_v24  ;;  %v2851_v24 = vld [vmem:[%s4536_s3 + $0x130] ss:$8 sps:$4 sm:$0xff]  }
 0x158   : > { %v3793_v12 = vpop.eup %2922  ;;  %2932 = vtanh.f32 %v1254_v56  ;;  %v1194_v19 = vadd.f32 %v1130_v2, %v3758_v3  ;;  %v1005_v14 = vmul.f32 %v3787_v17, %v3787_v17  ;;  %v3799_v18 = vadd.f32 %v827_v52, %v3553_v55 }
 0x159   : > { %v3801_v21 = vpop.eup %2924  ;;  %2934 = vtanh.f32 %v1257_v9  ;;  %2003 = vmatprep.mubr.bf16.mxu0 %v1538_v27  ;;  %v1537_v5 = vpack.c.bf16 %v1481_v11, %v1477_v6  ;;  %2079 = vmatpush1.bf16.msra.mxu0 %v2848_v10  ;;  %v3807_v26 = vadd.f32 %v829_v36, %v3548_v54  ;;  %v3810_v22 = vadd.f32 %v831_v42, %v3553_v55  ;;  %v835_v20 = vpop.f32.mrb[28].mxu1  ;;  %v2856_v36 = vld [vmem:[%s4536_s3 + $0x144] ss:$8 sps:$4 sm:$0xff]  }
 0x15a   : > { %v3812_v29 = vpop.eup %2926  ;;  %v1258_v52 = vmul.f32 0.7978846, %v1194_v19  ;;  %v1069_v34 = vmul.f32 %v1005_v14, %v3787_v17  ;;  %2080 = vmatprep.subr.bf16.mxu0 %v2853_v60  ;;  %v1006_v35 = vmul.f32 %v3799_v18, %v3799_v18  ;;  %v1358_v57 = vadd.f32 1.0, %v3714_v0  ;;  %v837_v38 = vpop.f32.mrb[29].mxu1  ;;  %v2859_v14 = vld [vmem:[%s4536_s3 + $0x154] ss:$8 sps:$4 sm:$0xff]  }
 0x15b   : > { %v3821_v41 = vpop.eup %2928  ;;  %2004 = vmatmul.mubr.bf16.gmra.mrb[4].mxu0 %v1537_v5  ;;  %v1009_v62 = vmul.f32 %v3807_v26, %v3807_v26  ;;  %v1010_v42 = vmul.f32 %v3810_v22, %v3810_v22  ;;  %v1362_v44 = vadd.f32 1.0, %v3722_v23  ;;  %v1357_v63 = vadd.f32 1.0, %v3710_v49  ;;  %v839_v46 = vpop.f32.mrb[30].mxu1  ;;  %v2854_v23 = vld [vmem:[%s4536_s3 + $0x140] ss:$8 sps:$4 sm:$0xff]  }
 0x15c   : > { %2936 = vtanh.f32 %v1258_v52  ;;  %v1133_v0 = vmul.f32 0.044715, %v1069_v34  ;;  %v1070_v47 = vmul.f32 %v1006_v35, %v3799_v18  ;;  %v1422_v10 = vmul.f32 0.5, %v1358_v57  ;;  %v841_v56 = vpop.f32.mrb[31].mxu1 }
 0x15d   : > { %2081 = vmatpush1.bf16.msra.mxu0 %v2851_v24  ;;  %v1073_v2 = vmul.f32 %v1009_v62, %v3807_v26  ;;  %v1074_v6 = vmul.f32 %v1010_v42, %v3810_v22  ;;  %v1426_v60 = vmul.f32 0.5, %v1362_v44  ;;  %v1361_v9 = vadd.f32 1.0, %v3718_v8 }
 0x15e   : > { %v1197_v49 = vadd.f32 %v1133_v0, %v3787_v17  ;;  %v1134_v27 = vmul.f32 0.044715, %v1070_v47  ;;  %v1486_v11 = vmul.f32 %v1422_v10, %v3618_v48  ;;  %v1421_v19 = vmul.f32 0.5, %v1357_v63  ;;  %2082 = vmatprep.subr.bf16.mxu0 %v2856_v36 }
 0x15f   : > { %v1137_v5 = vmul.f32 0.044715, %v1073_v2  ;;  %v1138_v24 = vmul.f32 0.044715, %v1074_v6  ;;  %v1490_v52 = vmul.f32 %v1426_v60, %v3630_v4  ;;  %v1425_v8 = vmul.f32 0.5, %v1361_v9 }
 0x160   : > { %v1261_v34 = vmul.f32 0.7978846, %v1197_v49  ;;  %v1198_v35 = vadd.f32 %v1134_v27, %v3799_v18  ;;  %v1485_v57 = vmul.f32 %v1421_v19, %v3613_v43  ;;  %v3845_v62 = vadd.f32 %v835_v20, %v3548_v54  ;;  %v2857_v4 = vld [vmem:[%s4536_s3 + $0x150] ss:$8 sps:$4 sm:$0xff]  }
 0x161   : > { %v3847_v48 = vpop.eup %2930  ;;  %v1201_v36 = vadd.f32 %v1137_v5, %v3807_v26  ;;  %v1202_v42 = vadd.f32 %v1138_v24, %v3810_v22  ;;  %v1542_v44 = vpack.c.bf16 %v1490_v52, %v1486_v11  ;;  %v1489_v63 = vmul.f32 %v1425_v8, %v3624_v61  ;;  %2083 = vmatpush1.bf16.msra.mxu0 %v2854_v23  ;;  %v878_v0 = vpop.f32.mrb[32].mxu1  ;;  %v2862_v61 = vld [vmem:[%s4536_s3 + $0x164] ss:$8 sps:$4 sm:$0xff]  }
 0x162   : > { %v3855_v47 = vpop.eup %2932  ;;  %2938 = vtanh.f32 %v1261_v34  ;;  %v1262_v43 = vmul.f32 0.7978846, %v1198_v35  ;;  %v1013_v20 = vmul.f32 %v3845_v62, %v3845_v62  ;;  %2084 = vmatprep.subr.bf16.mxu0 %v2859_v14  ;;  %v3860_v10 = vadd.f32 %v837_v38, %v3553_v55  ;;  %v3865_v2 = vpop.f32.mrb[33].mxu1 }
 0x163   : > { %v3867_v6 = vpop.eup %2934  ;;  %v1265_v60 = vmul.f32 0.7978846, %v1201_v36  ;;  %v1266_v9 = vmul.f32 0.7978846, %v1202_v42  ;;  %2013 = vmatprep.mubr.bf16.mxu0 %v1542_v44  ;;  %v1541_v23 = vpack.c.bf16 %v1489_v63, %v1485_v57  ;;  %v3870_v49 = vadd.f32 %v839_v46, %v3548_v54  ;;  %v882_v27 = vpop.f32.mrb[34].mxu1 }
 0x164   : > { %2940 = vtanh.f32 %v1262_v43  ;;  %v1077_v38 = vmul.f32 %v1013_v20, %v3845_v62  ;;  %v1014_v11 = vmul.f32 %v3860_v10, %v3860_v10  ;;  %v3876_v19 = vadd.f32 %v841_v56, %v3553_v55  ;;  %v884_v14 = vpop.f32.mrb[35].mxu1  ;;  %v2860_v56 = vld [vmem:[%s4536_s3 + $0x160] ss:$8 sps:$4 sm:$0xff]   ;;  %v2865_v57 = vld [vmem:[%s4536_s3 + $0x174] ss:$8 sps:$4 sm:$0xff]  }
 0x165   : > { %2942 = vtanh.f32 %v1265_v60  ;;  %2014 = vmatmul.mubr.bf16.gmra.mrb[8].mxu0 %v1541_v23  ;;  %v1017_v5 = vmul.f32 %v3870_v49, %v3870_v49  ;;  %v1366_v24 = vadd.f32 1.0, %v3761_v7  ;;  %v1370_v54 = vadd.f32 1.0, %v3773_v31 }
 0x166   : > { %v3882_v46 = vpop.eup %2936  ;;  %2944 = vtanh.f32 %v1266_v9  ;;  %v1141_v52 = vmul.f32 0.044715, %v1077_v38  ;;  %v1078_v8 = vmul.f32 %v1014_v11, %v3860_v10  ;;  %2085 = vmatpush1.bf16.msra.mxu0 %v2857_v4  ;;  %v1018_v55 = vmul.f32 %v3876_v19, %v3876_v19 }
 0x167   : > { %v1081_v34 = vmul.f32 %v1017_v5, %v3870_v49  ;;  %v1430_v35 = vmul.f32 0.5, %v1366_v24  ;;  %v1434_v7 = vmul.f32 0.5, %v1370_v54  ;;  %v1365_v31 = vadd.f32 1.0, %v3751_v58  ;;  %2086 = vmatprep.subr.bf16.mxu0 %v2862_v61  ;;  %v2863_v58 = vld [vmem:[%s4536_s3 + $0x170] ss:$8 sps:$4 sm:$0xff]  }
 0x168   : > { %v1205_v36 = vadd.f32 %v1141_v52, %v3845_v62  ;;  %v1142_v42 = vmul.f32 0.044715, %v1078_v8  ;;  %v1082_v44 = vmul.f32 %v1018_v55, %v3876_v19  ;;  %v1369_v63 = vadd.f32 1.0, %v3768_v1  ;;  %v2868_v54 = vld [vmem:[%s4536_s3 + $0x184] ss:$8 sps:$4 sm:$0xff]  }
 0x169   : > { %v1145_v4 = vmul.f32 0.044715, %v1081_v34  ;;  %v1494_v43 = vmul.f32 %v1430_v35, %v3651_v13  ;;  %v1498_v20 = vmul.f32 %v1434_v7, %v3665_v45  ;;  %v1429_v60 = vmul.f32 0.5, %v1365_v31  ;;  %v3903_v61 = vpop.f32.mrb[36].mxu1 }
 0x16a   : > { %v1269_v9 = vmul.f32 0.7978846, %v1205_v36  ;;  %v1206_v23 = vadd.f32 %v1142_v42, %v3860_v10  ;;  %v1146_v38 = vmul.f32 0.044715, %v1082_v44  ;;  %v1433_v11 = vmul.f32 0.5, %v1369_v63  ;;  %2087 = vmatpush1.bf16.msra.mxu0 %v2860_v56  ;;  %v3906_v5 = vpop.f32.mrb[37].mxu1 }
 0x16b   : > { %v1209_v1 = vadd.f32 %v1145_v4, %v3870_v49  ;;  %v1546_v13 = vpack.c.bf16 %v1498_v20, %v1494_v43  ;;  %v1493_v45 = vmul.f32 %v1429_v60, %v3647_v28  ;;  %v3911_v24 = vadd.f32 %v878_v0, %v3609_v40  ;;  %2088 = vmatprep.subr.bf16.mxu0 %v2865_v57  ;;  %v3916_v52 = vpop.f32.mrb[38].mxu1  ;;  %v2866_v44 = vld [vmem:[%s4536_s3 + $0x180] ss:$8 sps:$4 sm:$0xff]  }
 0x16c   : > { %v3918_v8 = vpop.eup %2938  ;;  %2946 = vtanh.f32 %v1269_v9  ;;  %v1270_v55 = vmul.f32 0.7978846, %v1206_v23  ;;  %v1210_v56 = vadd.f32 %v1146_v38, %v3876_v19  ;;  %v1497_v34 = vmul.f32 %v1433_v11, %v3659_v37  ;;  %v3922_v35 = vpop.f32.mrb[39].mxu1 }
 0x16d   : > { %v1273_v28 = vmul.f32 0.7978846, %v1209_v1  ;;  %2023 = vmatprep.mubr.bf16.mxu0 %v1546_v13  ;;  %v959_v0 = vmul.f32 %v3911_v24, %v3911_v24  ;;  %v3928_v7 = vadd.f32 %v3865_v2, %v3640_v16  ;;  %v3931_v31 = vadd.f32 %v882_v27, %v3609_v40  ;;  %v2869_v1 = vld [vmem:[%s4536_s3 + $0x190] ss:$8 sps:$4 sm:$0xff]  }
 0x16e   : > { %v3933_v57 = vpop.eup %2940  ;;  %2948 = vtanh.f32 %v1270_v55  ;;  %v1274_v36 = vmul.f32 0.7978846, %v1210_v56  ;;  %v1545_v42 = vpack.c.bf16 %v1497_v34, %v1493_v45  ;;  %2089 = vmatpush1.bf16.msra.mxu0 %v2863_v58  ;;  %v3936_v37 = vadd.f32 %v884_v14, %v3640_v16  ;;  %v2871_v14 = vld [vmem:[%s4536_s3 + $0x194] ss:$8 sps:$4 sm:$0xff]  }
 0x16f   : > { %v3941_v63 = vpop.eup %2942  ;;  %2950 = vtanh.f32 %v1273_v28  ;;  %v1023_v2 = vmul.f32 %v959_v0, %v3911_v24  ;;  %v960_v27 = vmul.f32 %v3928_v7, %v3928_v7  ;;  %v963_v4 = vmul.f32 %v3931_v31, %v3931_v31  ;;  %2090 = vmatprep.subr.bf16.mxu0 %v2868_v54 }
 0x170   : > { %v3951_v43 = vpop.eup %2944  ;;  %2952 = vtanh.f32 %v1274_v36  ;;  %2024 = vmatmul.mubr.bf16.gmra.mrb[12].mxu0 %v1545_v42  ;;  %v964_v20 = vmul.f32 %v3936_v37, %v3936_v37  ;;  %v1374_v60 = vadd.f32 1.0, %v3801_v21  ;;  %v1378_v58 = vadd.f32 1.0, %v3821_v41  ;;  %v2874_v41 = vld [vmem:[%s4536_s3 + $0x1a4] ss:$8 sps:$4 sm:$0xff]  }
 0x171   : > { %v1087_v9 = vmul.f32 0.044715, %v1023_v2  ;;  %v1024_v23 = vmul.f32 %v960_v27, %v3928_v7  ;;  %v1027_v38 = vmul.f32 %v963_v4, %v3931_v31  ;;  %v1373_v11 = vadd.f32 1.0, %v3793_v12  ;;  %v3963_v13 = vpop.f32.mrb[40].mxu1 }
 0x172   : > { %v1028_v45 = vmul.f32 %v964_v20, %v3936_v37  ;;  %v1438_v54 = vmul.f32 0.5, %v1374_v60  ;;  %v1442_v55 = vmul.f32 0.5, %v1378_v58  ;;  %v1377_v21 = vadd.f32 1.0, %v3812_v29  ;;  %2091 = vmatpush1.bf16.msra.mxu0 %v2866_v44  ;;  %v3970_v56 = vpop.f32.mrb[41].mxu1 }
 0x173   : > { %v1151_v12 = vadd.f32 %v1087_v9, %v3911_v24  ;;  %v1088_v34 = vmul.f32 0.044715, %v1024_v23  ;;  %v1091_v28 = vmul.f32 0.044715, %v1027_v38  ;;  %v1437_v0 = vmul.f32 0.5, %v1373_v11  ;;  %2092 = vmatprep.subr.bf16.mxu0 %v2871_v14  ;;  %v3973_v36 = vpop.f32.mrb[42].mxu1 }
 0x174   : > { %v1092_v42 = vmul.f32 0.044715, %v1028_v45  ;;  %v1502_v2 = vmul.f32 %v1438_v54, %v3689_v25  ;;  %v1506_v29 = vmul.f32 %v1442_v55, %v3702_v39  ;;  %v1441_v44 = vmul.f32 0.5, %v1377_v21  ;;  %v3977_v27 = vpop.f32.mrb[43].mxu1 }
 0x175   : > { %v1215_v4 = vmul.f32 0.7978846, %v1151_v12  ;;  %v1152_v20 = vadd.f32 %v1088_v34, %v3928_v7  ;;  %v1155_v60 = vadd.f32 %v1091_v28, %v3931_v31  ;;  %v1501_v58 = vmul.f32 %v1437_v0, %v3683_v15  ;;  %v2872_v15 = vld [vmem:[%s4536_s3 + $0x1a0] ss:$8 sps:$4 sm:$0xff]  }
 0x176   : > { %v3982_v9 = vpop.eup %2946  ;;  %v1156_v14 = vadd.f32 %v1092_v42, %v3936_v37  ;;  %v1550_v23 = vpack.c.bf16 %v1506_v29, %v1502_v2  ;;  %v1505_v38 = vmul.f32 %v1441_v44, %v3696_v32  ;;  %v3988_v25 = vadd.f32 %v3903_v61, %v3609_v40  ;;  %2093 = vmatpush1.bf16.msra.mxu0 %v2869_v1 }
 0x177   : > { %2954 = vtanh.f32 %v1215_v4  ;;  %v1216_v39 = vmul.f32 0.7978846, %v1152_v20  ;;  %v1219_v11 = vmul.f32 0.7978846, %v1155_v60  ;;  %v3992_v45 = vadd.f32 %v3906_v5, %v3640_v16  ;;  %2094 = vmatprep.subr.bf16.mxu0 %v2874_v41  ;;  %v2877_v5 = vld [vmem:[%s4536_s3 + $0x1b4] ss:$8 sps:$4 sm:$0xff]  }
 0x178   : > { %v3997_v54 = vpop.eup %2948  ;;  %v1220_v32 = vmul.f32 0.7978846, %v1156_v14  ;;  %2033 = vmatprep.mubr.bf16.mxu0 %v1550_v23  ;;  %v1549_v55 = vpack.c.bf16 %v1505_v38, %v1501_v58  ;;  %v967_v61 = vmul.f32 %v3988_v25, %v3988_v25  ;;  %v4003_v1 = vadd.f32 %v3916_v52, %v3609_v40  ;;  %v2875_v4 = vld [vmem:[%s4536_s3 + $0x1b0] ss:$8 sps:$4 sm:$0xff]   ;;  %v2880_v20 = vld [vmem:[%s4536_s3 + $0x1c4] ss:$8 sps:$4 sm:$0xff]  }
 0x179   : > { %v4008_v21 = vpop.eup %2950  ;;  %2956 = vtanh.f32 %v1216_v39  ;;  %v968_v41 = vmul.f32 %v3992_v45, %v3992_v45  ;;  %v4014_v12 = vadd.f32 %v3922_v35, %v3640_v16  ;;  %v1382_v34 = vadd.f32 1.0, %v3855_v47  ;;  %v4017_v28 = vpop.f32.mrb[44].mxu1 }
 0x17a   : > { %v4019_v52 = vpop.eup %2952  ;;  %2958 = vtanh.f32 %v1219_v11  ;;  %2034 = vmatmul.mubr.bf16.gmra.mrb[16].mxu0 %v1549_v55  ;;  %v1031_v0 = vmul.f32 %v967_v61, %v3988_v25  ;;  %v971_v42 = vmul.f32 %v4003_v1, %v4003_v1  ;;  %v1386_v2 = vadd.f32 1.0, %v3882_v46  ;;  %v4025_v29 = vpop.f32.mrb[45].mxu1 }
 0x17b   : > { %2960 = vtanh.f32 %v1220_v32  ;;  %v1032_v35 = vmul.f32 %v968_v41, %v3992_v45  ;;  %v972_v47 = vmul.f32 %v4014_v12, %v4014_v12  ;;  %v1446_v44 = vmul.f32 0.5, %v1382_v34  ;;  %2095 = vmatpush1.bf16.msra.mxu0 %v2872_v15  ;;  %v4036_v60 = vpop.f32.mrb[46].mxu1 }
 0x17c   : > { %v1095_v46 = vmul.f32 0.044715, %v1031_v0  ;;  %v1035_v58 = vmul.f32 %v971_v42, %v4003_v1  ;;  %v1450_v14 = vmul.f32 0.5, %v1386_v2  ;;  %v1381_v23 = vadd.f32 1.0, %v3847_v48  ;;  %2096 = vmatprep.subr.bf16.mxu0 %v2877_v5  ;;  %v4040_v38 = vpop.f32.mrb[47].mxu1 }
 0x17d   : > { %v1096_v39 = vmul.f32 0.044715, %v1032_v35  ;;  %v1036_v11 = vmul.f32 %v972_v47, %v4014_v12  ;;  %v1510_v15 = vmul.f32 %v1446_v44, %v3732_v33  ;;  %v1385_v32 = vadd.f32 1.0, %v3867_v6  ;;  %v2878_v33 = vld [vmem:[%s4536_s3 + $0x1c0] ss:$8 sps:$4 sm:$0xff]  }
 0x17e   : > { %v1159_v55 = vadd.f32 %v1095_v46, %v3988_v25  ;;  %v1099_v61 = vmul.f32 0.044715, %v1035_v58  ;;  %v1514_v41 = vmul.f32 %v1450_v14, %v3758_v3  ;;  %v1445_v34 = vmul.f32 0.5, %v1381_v23  ;;  %v2883_v47 = vld [vmem:[%s4536_s3 + $0x1d4] ss:$8 sps:$4 sm:$0xff]  }
 0x17f   : > { %v1160_v0 = vadd.f32 %v1096_v39, %v3992_v45  ;;  %v1100_v42 = vmul.f32 0.044715, %v1036_v11  ;;  %v1449_v48 = vmul.f32 0.5, %v1385_v32  ;;  %v4050_v5 = vadd.f32 %v3963_v13, %v3609_v40  ;;  %2097 = vmatpush1.bf16.msra.mxu0 %v2875_v4 }
 0x180   : > { %v1223_v6 = vmul.f32 0.7978846, %v1159_v55  ;;  %v1163_v2 = vadd.f32 %v1099_v61, %v4003_v1  ;;  %v1554_v35 = vpack.c.bf16 %v1514_v41, %v1510_v15  ;;  %v1509_v3 = vmul.f32 %v1445_v34, %v3727_v30  ;;  %2098 = vmatprep.subr.bf16.mxu0 %v2880_v20  ;;  %v2881_v55 = vld [vmem:[%s4536_s3 + $0x1d0] ss:$8 sps:$4 sm:$0xff]  }
 0x181   : > { %v2955_v44 = vpop.eup %2954  ;;  %v1224_v46 = vmul.f32 0.7978846, %v1160_v0  ;;  %v1164_v13 = vadd.f32 %v1100_v42, %v4014_v12  ;;  %v1513_v4 = vmul.f32 %v1449_v48, %v3741_v59  ;;  %v975_v58 = vmul.f32 %v4050_v5, %v4050_v5  ;;  %v4064_v14 = vpop.f32.mrb[48].mxu1  ;;  %v2886_v42 = vld [vmem:[%s4536_s3 + $0x1e4] ss:$8 sps:$4 sm:$0xff]  }
 0x182   : > { %v1343_v23 = vadd.f32 1.0, %v2955_v44  ;;  %2962 = vtanh.f32 %v1223_v6  ;;  %v1227_v39 = vmul.f32 0.7978846, %v1163_v2  ;;  %2043 = vmatprep.mubr.bf16.mxu0 %v1554_v35  ;;  %v4068_v30 = vadd.f32 %v3970_v56, %v3640_v16  ;;  %v4070_v20 = vpop.f32.mrb[49].mxu1 }
 0x183   : > { %v4072_v11 = vpop.eup %2956  ;;  %2964 = vtanh.f32 %v1224_v46  ;;  %v1228_v15 = vmul.f32 0.7978846, %v1164_v13  ;;  %v1553_v59 = vpack.c.bf16 %v1513_v4, %v1509_v3  ;;  %v1039_v32 = vmul.f32 %v975_v58, %v4050_v5  ;;  %2099 = vmatpush1.bf16.msra.mxu0 %v2878_v33  ;;  %v4078_v61 = vpop.f32.mrb[50].mxu1 }
 0x184   : > { %v2959_v41 = vpop.eup %2958  ;;  %v1407_v34 = vmul.f32 0.5, %v1343_v23  ;;  %2966 = vtanh.f32 %v1227_v39  ;;  %v976_v56 = vmul.f32 %v4068_v30, %v4068_v30  ;;  %v4084_v0 = vadd.f32 %v3973_v36, %v3609_v40  ;;  %2100 = vmatprep.subr.bf16.mxu0 %v2883_v47  ;;  %v4089_v48 = vpop.f32.mrb[51].mxu1 }
 0x185   : > { %v4091_v33 = vpop.eup %2960  ;;  %v1347_v6 = vadd.f32 1.0, %v2959_v41  ;;  %2968 = vtanh.f32 %v1228_v15  ;;  %2044 = vmatmul.mubr.bf16.gmra.mrb[20].mxu0 %v1553_v59  ;;  %v1103_v2 = vmul.f32 0.044715, %v1039_v32  ;;  %v4095_v35 = vadd.f32 %v3977_v27, %v3640_v16 }
 0x186   : > { %v4098_v36 = vmul.f32 %v1407_v34, %v3911_v24  ;;  %v1040_v3 = vmul.f32 %v976_v56, %v4068_v30  ;;  %v979_v47 = vmul.f32 %v4084_v0, %v4084_v0  ;;  %v1390_v44 = vadd.f32 1.0, %v3933_v57  ;;  %v2884_v24 = vld [vmem:[%s4536_s3 + $0x1e0] ss:$8 sps:$4 sm:$0xff]   ;;  %v2889_v57 = vld [vmem:[%s4536_s3 + $0x1f4] ss:$8 sps:$4 sm:$0xff]  }
 0x187   : > { %v1411_v46 = vmul.f32 0.5, %v1347_v6  ;;  %v1167_v13 = vadd.f32 %v1103_v2, %v4050_v5  ;;  %v980_v4 = vmul.f32 %v4095_v35, %v4095_v35  ;;  %v1394_v58 = vadd.f32 1.0, %v3951_v43  ;;  %2101 = vmatpush1.bf16.msra.mxu0 %v2881_v55 }
 0x188   : > { %v1104_v27 = vmul.f32 0.044715, %v1040_v3  ;;  %v1043_v23 = vmul.f32 %v979_v47, %v4084_v0  ;;  %v1454_v39 = vmul.f32 0.5, %v1390_v44  ;;  %v1389_v15 = vadd.f32 1.0, %v3918_v8  ;;  %2102 = vmatprep.subr.bf16.mxu0 %v2886_v42  ;;  %v2887_v47 = vld [vmem:[%s4536_s3 + $0x1f0] ss:$8 sps:$4 sm:$0xff]  }
 0x189   : > { %v4117_v59 = vmul.f32 %v1411_v46, %v3931_v31  ;;  %v1231_v43 = vmul.f32 0.7978846, %v1167_v13  ;;  %v1044_v32 = vmul.f32 %v980_v4, %v4095_v35  ;;  %v1458_v55 = vmul.f32 0.5, %v1394_v58  ;;  %v4120_v41 = vpop.f32.mrb[52].mxu1 }
 0x18a   : > { %v1168_v34 = vadd.f32 %v1104_v27, %v4068_v30  ;;  %v1107_v56 = vmul.f32 0.044715, %v1043_v23  ;;  %v1518_v6 = vmul.f32 %v1454_v39, %v3799_v18  ;;  %v1393_v8 = vadd.f32 1.0, %v3941_v63  ;;  %v4125_v42 = vpop.f32.mrb[53].mxu1 }
 0x18b   : > { %v1535_v2 = vpack.c.bf16 %v4117_v59, %v4098_v36  ;;  %2970 = vtanh.f32 %v1231_v43  ;;  %v1108_v31 = vmul.f32 0.044715, %v1044_v32  ;;  %v1522_v3 = vmul.f32 %v1458_v55, %v3810_v22  ;;  %2103 = vmatpush1.bf16.msra.mxu0 %v2884_v24  ;;  %v4133_v44 = vpop.f32.mrb[54].mxu1 }
 0x18c   : > { %v4135_v46 = vpop.eup %2962  ;;  %v1232_v18 = vmul.f32 0.7978846, %v1168_v34  ;;  %v1171_v63 = vadd.f32 %v1107_v56, %v4084_v0  ;;  %v1453_v13 = vmul.f32 0.5, %v1389_v15  ;;  %v1457_v4 = vmul.f32 0.5, %v1393_v8  ;;  %2104 = vmatprep.subr.bf16.mxu0 %v2889_v57  ;;  %v4138_v58 = vpop.f32.mrb[55].mxu1 }
 0x18d   : > { %v4140_v27 = vpop.eup %2964  ;;  %v1172_v22 = vadd.f32 %v1108_v31, %v4095_v35  ;;  %v1558_v24 = vpack.c.bf16 %v1522_v3, %v1518_v6  ;;  %v4145_v23 = vadd.f32 %v4017_v28, %v3609_v40  ;;  %v4149_v39 = vadd.f32 %v4025_v29, %v3640_v16 }
 0x18e   : > { %v4151_v43 = vpop.eup %2966  ;;  %2972 = vtanh.f32 %v1232_v18  ;;  %v1235_v15 = vmul.f32 0.7978846, %v1171_v63  ;;  %v1517_v57 = vmul.f32 %v1453_v13, %v3787_v17  ;;  %v1521_v32 = vmul.f32 %v1457_v4, %v3807_v26 }
 0x18f   : > { %v4155_v55 = vpop.eup %2968  ;;  %v1236_v34 = vmul.f32 0.7978846, %v1172_v22  ;;  %2053 = vmatprep.mubr.bf16.mxu0 %v1558_v24  ;;  %v983_v28 = vmul.f32 %v4145_v23, %v4145_v23  ;;  %v984_v56 = vmul.f32 %v4149_v39, %v4149_v39  ;;  %v4163_v29 = vadd.f32 %v4036_v60, %v3609_v40  ;;  %2105 = vmatpush1.bf16.msra.mxu0 %v2887_v47 }
 0x190   : > { %2974 = vtanh.f32 %v1235_v15  ;;  %v1557_v6 = vpack.c.bf16 %v1521_v32, %v1517_v57  ;;  %v4167_v17 = vadd.f32 %v4040_v38, %v3640_v16  ;;  %v1398_v26 = vadd.f32 1.0, %v3997_v54 }
 0x191   : > { %2976 = vtanh.f32 %v1236_v34  ;;  %v1047_v8 = vmul.f32 %v983_v28, %v4145_v23  ;;  %v1048_v31 = vmul.f32 %v984_v56, %v4149_v39  ;;  %v987_v3 = vmul.f32 %v4163_v29, %v4163_v29  ;;  %v4174_v18 = vpop.f32.mrb[56].mxu1 }
 0x192   : > { %2054 = vmatmul.mubr.bf16.gmra.mrb[24].mxu0 %v1557_v6  ;;  %v988_v60 = vmul.f32 %v4167_v17, %v4167_v17  ;;  %v1402_v47 = vadd.f32 1.0, %v4019_v52  ;;  %v1462_v38 = vmul.f32 0.5, %v1398_v26  ;;  %v1397_v63 = vadd.f32 1.0, %v3982_v9  ;;  %v4180_v54 = vpop.f32.mrb[57].mxu1 }
 0x193   : > { %v1111_v13 = vmul.f32 0.044715, %v1047_v8  ;;  %v1112_v4 = vmul.f32 0.044715, %v1048_v31  ;;  %v1051_v22 = vmul.f32 %v987_v3, %v4163_v29  ;;  %v1401_v24 = vadd.f32 1.0, %v4008_v21  ;;  %v4184_v15 = vpop.f32.mrb[58].mxu1 }
 0x194   : > { %v1052_v57 = vmul.f32 %v988_v60, %v4167_v17  ;;  %v1466_v32 = vmul.f32 0.5, %v1402_v47  ;;  %v1526_v34 = vmul.f32 %v1462_v38, %v3860_v10  ;;  %v1461_v28 = vmul.f32 0.5, %v1397_v63  ;;  %v4188_v52 = vpop.f32.mrb[59].mxu1 }
 0x195   : > { %v4190_v56 = vpop.eup %2970  ;;  %v1175_v9 = vadd.f32 %v1111_v13, %v4145_v23  ;;  %v1176_v6 = vadd.f32 %v1112_v4, %v4149_v39  ;;  %v1115_v26 = vmul.f32 0.044715, %v1051_v22  ;;  %v1465_v8 = vmul.f32 0.5, %v1401_v24 }
 0x196   : > { %v1116_v31 = vmul.f32 0.044715, %v1052_v57  ;;  %v1530_v21 = vmul.f32 %v1466_v32, %v3876_v19  ;;  %v1525_v3 = vmul.f32 %v1461_v28, %v3845_v62  ;;  %v4198_v60 = vadd.f32 %v4064_v14, %v3609_v40 }
 0x197   : > { %v1239_v10 = vmul.f32 0.7978846, %v1175_v9  ;;  %v1240_v47 = vmul.f32 0.7978846, %v1176_v6  ;;  %v1179_v38 = vadd.f32 %v1115_v26, %v4163_v29  ;;  %v1529_v63 = vmul.f32 %v1465_v8, %v3870_v49 }
 0x198   : > { %v4202_v13 = vpop.eup %2972  ;;  %v1180_v4 = vadd.f32 %v1116_v31, %v4167_v17  ;;  %v1562_v22 = vpack.c.bf16 %v1530_v21, %v1526_v34  ;;  %v991_v19 = vmul.f32 %v4198_v60, %v4198_v60  ;;  %v4209_v62 = vadd.f32 %v4070_v20, %v3640_v16 }
 0x199   : > { %2978 = vtanh.f32 %v1239_v10  ;;  %v1243_v14 = vmul.f32 0.7978846, %v1179_v38  ;;  %v1561_v24 = vpack.c.bf16 %v1529_v63, %v1525_v3  ;;  %v4213_v57 = vadd.f32 %v4078_v61, %v3609_v40  ;;  %v4215_v49 = vpop.f32.mrb[60].mxu1 }
 0x19a   : > { %v4217_v32 = vpop.eup %2974  ;;  %2980 = vtanh.f32 %v1240_v47  ;;  %v1244_v34 = vmul.f32 0.7978846, %v1180_v4  ;;  %2063 = vmatprep.mubr.bf16.mxu0 %v1562_v22  ;;  %v1055_v28 = vmul.f32 %v991_v19, %v4198_v60  ;;  %v992_v20 = vmul.f32 %v4209_v62, %v4209_v62  ;;  %v4222_v9 = vpop.f32.mrb[61].mxu1 }
 0x19b   : > { %v4224_v6 = vpop.eup %2976  ;;  %2982 = vtanh.f32 %v1243_v14  ;;  %2064 = vmatmul.mubr.bf16.gmra.mrb[28].mxu0 %v1561_v24  ;;  %v995_v61 = vmul.f32 %v4213_v57, %v4213_v57  ;;  %v4230_v26 = vadd.f32 %v4089_v48, %v3640_v16  ;;  %v1344_v8 = vadd.f32 1.0, %v4072_v11  ;;  %v4233_v31 = vpop.f32.mrb[62].mxu1 }
 0x19c   : > { %2984 = vtanh.f32 %v1244_v34  ;;  %v1119_v21 = vmul.f32 0.044715, %v1055_v28  ;;  %v1056_v3 = vmul.f32 %v992_v20, %v4209_v62  ;;  %v1348_v10 = vadd.f32 1.0, %v4091_v33  ;;  %v4237_v47 = vpop.f32.mrb[63].mxu1 }
 0x19d   : > { %v1059_v38 = vmul.f32 %v995_v61, %v4213_v57  ;;  %v996_v63 = vmul.f32 %v4230_v26, %v4230_v26  ;;  %v1408_v4 = vmul.f32 0.5, %v1344_v8  ;;  %v4244_v48 = vadd.f32 %v4120_v41, %v3609_v40 }
 0x19e   : > { %v1183_v11 = vadd.f32 %v1119_v21, %v4198_v60  ;;  %v1120_v22 = vmul.f32 0.044715, %v1056_v3  ;;  %v1412_v19 = vmul.f32 0.5, %v1348_v10  ;;  %v4249_v14 = vadd.f32 %v4125_v42, %v3640_v16 }
 0x19f   : > { %v1123_v33 = vmul.f32 0.044715, %v1059_v38  ;;  %v1060_v24 = vmul.f32 %v996_v63, %v4230_v26  ;;  %v1472_v34 = vmul.f32 %v1408_v4, %v3928_v7  ;;  %v999_v28 = vmul.f32 %v4244_v48, %v4244_v48 }
 0x1a0   : > { %v1247_v20 = vmul.f32 0.7978846, %v1183_v11  ;;  %v1184_v41 = vadd.f32 %v1120_v22, %v4209_v62  ;;  %v1476_v61 = vmul.f32 %v1412_v19, %v3936_v37  ;;  %v1000_v8 = vmul.f32 %v4249_v14, %v4249_v14 }
 0x1a1   : > { %v1187_v21 = vadd.f32 %v1123_v33, %v4213_v57  ;;  %v1124_v42 = vmul.f32 0.044715, %v1060_v24  ;;  %v1063_v3 = vmul.f32 %v999_v28, %v4244_v48  ;;  %v4263_v10 = vadd.f32 %v4133_v44, %v3609_v40 }
 0x1a2   : > { %2986 = vtanh.f32 %v1247_v20  ;;  %v1248_v7 = vmul.f32 0.7978846, %v1184_v41  ;;  %v1536_v38 = vpack.c.bf16 %v1476_v61, %v1472_v34  ;;  %v1064_v63 = vmul.f32 %v1000_v8, %v4249_v14 }
 0x1a3   : > { %v4266_v4 = vpop.eup %2978  ;;  %v1251_v37 = vmul.f32 0.7978846, %v1187_v21  ;;  %v1188_v11 = vadd.f32 %v1124_v42, %v4230_v26  ;;  %v1127_v22 = vmul.f32 0.044715, %v1063_v3  ;;  %v1003_v19 = vmul.f32 %v4263_v10, %v4263_v10 }
 0x1a4   : > { %v4271_v33 = vpop.eup %2980  ;;  %2988 = vtanh.f32 %v1248_v7  ;;  %2106 = vmatprep.mubr.bf16.mxu0 %v1536_v38  ;;  %v1128_v44 = vmul.f32 0.044715, %v1064_v63  ;;  %v4275_v24 = vadd.f32 %v4138_v58, %v3640_v16  ;;  %v1352_v34 = vadd.f32 1.0, %v4140_v27 }
 0x1a5   : > { %v4278_v28 = vpop.eup %2982  ;;  %2990 = vtanh.f32 %v1251_v37  ;;  %v1252_v20 = vmul.f32 0.7978846, %v1188_v11  ;;  %2107 = vmatmul.mubr.bf16.vlgmr.msra.gmra.mrb[0].mxu0 %v1535_v2  ;;  %v1191_v41 = vadd.f32 %v1127_v22, %v4244_v48  ;;  %v1067_v61 = vmul.f32 %v1003_v19, %v4263_v10 }
 0x1a6   : > { %v4285_v8 = vpop.eup %2984  ;;  %v1192_v21 = vadd.f32 %v1128_v44, %v4249_v14  ;;  %v1004_v58 = vmul.f32 %v4275_v24, %v4275_v24  ;;  %v1356_v27 = vadd.f32 1.0, %v4155_v55  ;;  %v1416_v42 = vmul.f32 0.5, %v1352_v34 }
 0x1a7   : > { %2992 = vtanh.f32 %v1252_v20  ;;  %v1255_v3 = vmul.f32 0.7978846, %v1191_v41  ;;  %v1131_v7 = vmul.f32 0.044715, %v1067_v61  ;;  %v1351_v36 = vadd.f32 1.0, %v4135_v46 }
 0x1a8   : > { %v1256_v59 = vmul.f32 0.7978846, %v1192_v21  ;;  %v1068_v2 = vmul.f32 %v1004_v58, %v4275_v24  ;;  %v1420_v38 = vmul.f32 0.5, %v1356_v27  ;;  %v1480_v63 = vmul.f32 %v1416_v42, %v3992_v45 }
 0x1a9   : > { %2994 = vtanh.f32 %v1255_v3  ;;  %v1195_v37 = vadd.f32 %v1131_v7, %v4263_v10  ;;  %v1355_v11 = vadd.f32 1.0, %v4151_v43  ;;  %v1415_v22 = vmul.f32 0.5, %v1351_v36 }
 0x1aa   : > { %2996 = vtanh.f32 %v1256_v59  ;;  %v1132_v55 = vmul.f32 0.044715, %v1068_v2  ;;  %v1484_v19 = vmul.f32 %v1420_v38, %v4014_v12  ;;  %v4299_v44 = vadd.f32 %v4174_v18, %v3609_v40 }
 0x1ab   : > { %v1259_v46 = vmul.f32 0.7978846, %v1195_v37  ;;  %v1419_v34 = vmul.f32 0.5, %v1355_v11  ;;  %v1479_v20 = vmul.f32 %v1415_v22, %v3988_v25  ;;  %v4304_v45 = vadd.f32 %v4180_v54, %v3640_v16 }
 0x1ac   : > { %v4306_v41 = vpop.eup %2986  ;;  %v1196_v43 = vadd.f32 %v1132_v55, %v4275_v24  ;;  %v1540_v61 = vpack.c.bf16 %v1484_v19, %v1480_v63  ;;  %v1007_v12 = vmul.f32 %v4299_v44, %v4299_v44  ;;  %v4313_v18 = vadd.f32 %v4184_v15, %v3609_v40 }
 0x1ad   : > { %2998 = vtanh.f32 %v1259_v46  ;;  %v1483_v21 = vmul.f32 %v1419_v34, %v4003_v1  ;;  %v1008_v25 = vmul.f32 %v4304_v45, %v4304_v45  ;;  %v4320_v54 = vadd.f32 %v4188_v52, %v3640_v16 }
 0x1ae   : > { %v4322_v58 = vpop.eup %2988  ;;  %v1260_v27 = vmul.f32 0.7978846, %v1196_v43  ;;  %2116 = vmatprep.mubr.bf16.mxu0 %v1540_v61  ;;  %v1071_v42 = vmul.f32 %v1007_v12, %v4299_v44  ;;  %v1011_v15 = vmul.f32 %v4313_v18, %v4313_v18  ;;  %v1360_v3 = vadd.f32 1.0, %v4202_v13 }
 0x1af   : > { %v4328_v7 = vpop.eup %2990  ;;  %v1539_v1 = vpack.c.bf16 %v1483_v21, %v1479_v20  ;;  %v1072_v36 = vmul.f32 %v1008_v25, %v4304_v45  ;;  %v1012_v52 = vmul.f32 %v4320_v54, %v4320_v54  ;;  %v1364_v59 = vadd.f32 1.0, %v4224_v6 }
 0x1b0   : > { %3000 = vtanh.f32 %v1260_v27  ;;  %v1135_v2 = vmul.f32 0.044715, %v1071_v42  ;;  %v1075_v38 = vmul.f32 %v1011_v15, %v4313_v18  ;;  %v1424_v63 = vmul.f32 0.5, %v1360_v3 }
 0x1b1   : > { %v4335_v37 = vpop.eup %2992  ;;  %2117 = vmatmul.mubr.bf16.gmra.mrb[4].mxu0 %v1539_v1  ;;  %v1136_v11 = vmul.f32 0.044715, %v1072_v36  ;;  %v1076_v13 = vmul.f32 %v1012_v52, %v4320_v54  ;;  %v1428_v22 = vmul.f32 0.5, %v1364_v59  ;;  %v1359_v55 = vadd.f32 1.0, %v4190_v56 }
 0x1b2   : > { %v1199_v19 = vadd.f32 %v1135_v2, %v4299_v44  ;;  %v1139_v46 = vmul.f32 0.044715, %v1075_v38  ;;  %v1488_v34 = vmul.f32 %v1424_v63, %v4068_v30  ;;  %v1363_v6 = vadd.f32 1.0, %v4217_v32 }
 0x1b3   : > { %v4342_v20 = vpop.eup %2994  ;;  %v1200_v43 = vadd.f32 %v1136_v11, %v4304_v45  ;;  %v1140_v61 = vmul.f32 0.044715, %v1076_v13  ;;  %v1492_v12 = vmul.f32 %v1428_v22, %v4095_v35  ;;  %v1423_v21 = vmul.f32 0.5, %v1359_v55 }
 0x1b4   : > { %v4346_v25 = vpop.eup %2996  ;;  %v1263_v27 = vmul.f32 0.7978846, %v1199_v19  ;;  %v1203_v56 = vadd.f32 %v1139_v46, %v4313_v18  ;;  %v1427_v42 = vmul.f32 0.5, %v1363_v6  ;;  %v4351_v15 = vadd.f32 %v4215_v49, %v3609_v40 }
 0x1b5   : > { %v1264_v30 = vmul.f32 0.7978846, %v1200_v43  ;;  %v1204_v32 = vadd.f32 %v1140_v61, %v4320_v54  ;;  %v1544_v3 = vpack.c.bf16 %v1492_v12, %v1488_v34  ;;  %v1487_v1 = vmul.f32 %v1423_v21, %v4050_v5 }
 0x1b6   : > { %3002 = vtanh.f32 %v1263_v27  ;;  %v1267_v36 = vmul.f32 0.7978846, %v1203_v56  ;;  %v1491_v35 = vmul.f32 %v1427_v42, %v4084_v0  ;;  %v1015_v52 = vmul.f32 %v4351_v15, %v4351_v15 }
 0x1b7   : > { %v4358_v59 = vpop.eup %2998  ;;  %3004 = vtanh.f32 %v1264_v30  ;;  %v1268_v2 = vmul.f32 0.7978846, %v1204_v32  ;;  %2126 = vmatprep.mubr.bf16.mxu0 %v1544_v3  ;;  %v4362_v49 = vadd.f32 %v4222_v9, %v3640_v16  ;;  %v4366_v38 = vadd.f32 %v4233_v31, %v3609_v40 }
 0x1b8   : > { %3006 = vtanh.f32 %v1267_v36  ;;  %v1543_v5 = vpack.c.bf16 %v1491_v35, %v1487_v1  ;;  %v1079_v0 = vmul.f32 %v1015_v52, %v4351_v15  ;;  %v4371_v63 = vadd.f32 %v4237_v47, %v3640_v16 }
 0x1b9   : > { %3008 = vtanh.f32 %v1268_v2  ;;  %v1016_v11 = vmul.f32 %v4362_v49, %v4362_v49  ;;  %v1019_v9 = vmul.f32 %v4366_v38, %v4366_v38  ;;  %v1368_v13 = vadd.f32 1.0, %v4271_v33 }
 0x1ba   : > { %v3001_v22 = vpop.eup %3000  ;;  %2127 = vmatmul.mubr.bf16.gmra.mrb[8].mxu0 %v1543_v5  ;;  %v1143_v40 = vmul.f32 0.044715, %v1079_v0  ;;  %v1020_v31 = vmul.f32 %v4371_v63, %v4371_v63  ;;  %v1372_v55 = vadd.f32 1.0, %v4285_v8  ;;  %v1367_v16 = vadd.f32 1.0, %v4266_v4 }
 0x1bb   : > { %v1080_v47 = vmul.f32 %v1016_v11, %v4362_v49  ;;  %v1083_v19 = vmul.f32 %v1019_v9, %v4366_v38  ;;  %v1432_v46 = vmul.f32 0.5, %v1368_v13  ;;  %v1371_v34 = vadd.f32 1.0, %v4278_v28 }
 0x1bc   : > { %v1207_v6 = vadd.f32 %v1143_v40, %v4351_v15  ;;  %v1084_v33 = vmul.f32 %v1020_v31, %v4371_v63  ;;  %v1436_v43 = vmul.f32 0.5, %v1372_v55  ;;  %v1431_v61 = vmul.f32 0.5, %v1367_v16 }
 0x1bd   : > { %v1144_v12 = vmul.f32 0.044715, %v1080_v47  ;;  %v1147_v21 = vmul.f32 0.044715, %v1083_v19  ;;  %v1496_v27 = vmul.f32 %v1432_v46, %v4149_v39  ;;  %v1435_v8 = vmul.f32 0.5, %v1371_v34 }
 0x1be   : > { %v1271_v56 = vmul.f32 0.7978846, %v1207_v6  ;;  %v1148_v4 = vmul.f32 0.044715, %v1084_v33  ;;  %v1500_v42 = vmul.f32 %v1436_v43, %v4167_v17  ;;  %v1495_v30 = vmul.f32 %v1431_v61, %v4145_v23 }
 0x1bf   : > { %v1208_v32 = vadd.f32 %v1144_v12, %v4362_v49  ;;  %v1211_v28 = vadd.f32 %v1147_v21, %v4366_v38  ;;  %v1499_v3 = vmul.f32 %v1435_v8, %v4163_v29  ;;  %v1376_v1 = vadd.f32 1.0, %v4322_v58 }
 0x1c0   : > { %v3003_v36 = vpop.eup %3002  ;;  %3010 = vtanh.f32 %v1271_v56  ;;  %v1212_v35 = vadd.f32 %v1148_v4, %v4371_v63  ;;  %v1548_v39 = vpack.c.bf16 %v1500_v42, %v1496_v27  ;;  %v1380_v52 = vadd.f32 1.0, %v4335_v37 }
 0x1c1   : > { %v3005_v2 = vpop.eup %3004  ;;  %v1272_v5 = vmul.f32 0.7978846, %v1208_v32  ;;  %v1275_v17 = vmul.f32 0.7978846, %v1211_v28  ;;  %v1547_v0 = vpack.c.bf16 %v1499_v3, %v1495_v30  ;;  %v1440_v23 = vmul.f32 0.5, %v1376_v1 }
 0x1c2   : > { %v3007_v11 = vpop.eup %3006  ;;  %v1276_v9 = vmul.f32 0.7978846, %v1212_v35  ;;  %2136 = vmatprep.mubr.bf16.mxu0 %v1548_v39  ;;  %v1444_v13 = vmul.f32 0.5, %v1380_v52  ;;  %v1375_v29 = vadd.f32 1.0, %v4306_v41  ;;  %v1379_v58 = vadd.f32 1.0, %v4328_v7 }
 0x1c3   : > { %v3009_v40 = vpop.eup %3008  ;;  %3012 = vtanh.f32 %v1272_v5  ;;  %2137 = vmatmul.mubr.bf16.gmra.mrb[12].mxu0 %v1547_v0  ;;  %v1504_v31 = vmul.f32 %v1440_v23, %v4209_v62  ;;  %v1384_v37 = vadd.f32 1.0, %v4346_v25  ;;  %v1388_v55 = vadd.f32 1.0, %v3001_v22 }
 0x1c4   : > { %3014 = vtanh.f32 %v1275_v17  ;;  %v1508_v16 = vmul.f32 %v1444_v13, %v4230_v26  ;;  %v1439_v47 = vmul.f32 0.5, %v1375_v29  ;;  %v1443_v19 = vmul.f32 0.5, %v1379_v58  ;;  %v1629_v29 = vld [vmem:[%s4537_s4] sm:$0x3] }
 0x1c5   : > { %3016 = vtanh.f32 %v1276_v9  ;;  %v1448_v46 = vmul.f32 0.5, %v1384_v37  ;;  %v1452_v34 = vmul.f32 0.5, %v1388_v55  ;;  %v1383_v41 = vadd.f32 1.0, %v4342_v20 }
 0x1c6   : > { %v1552_v6 = vpack.c.bf16 %v1508_v16, %v1504_v31  ;;  %v1503_v7 = vmul.f32 %v1439_v47, %v4198_v60  ;;  %v1507_v33 = vmul.f32 %v1443_v19, %v4213_v57  ;;  %v1387_v62 = vadd.f32 1.0, %v4358_v59 }
 0x1c7   : > { %v1512_v25 = vmul.f32 %v1448_v46, %v4249_v14  ;;  %v1516_v22 = vmul.f32 %v1452_v34, %v4275_v24  ;;  %v1447_v43 = vmul.f32 0.5, %v1383_v41  ;;  %v1392_v26 = vadd.f32 1.0, %v3005_v2 }
 0x1c8   : > { %2146 = vmatprep.mubr.bf16.mxu0 %v1552_v6  ;;  %v1551_v61 = vpack.c.bf16 %v1507_v33, %v1503_v7  ;;  %v1451_v12 = vmul.f32 0.5, %v1387_v62  ;;  %v1396_v21 = vadd.f32 1.0, %v3009_v40  ;;  %v1391_v27 = vadd.f32 1.0, %v3003_v36 }
 0x1c9   : > { %v1556_v8 = vpack.c.bf16 %v1516_v22, %v1512_v25  ;;  %v1456_v20 = vmul.f32 0.5, %v1392_v26  ;;  %v1395_v56 = vadd.f32 1.0, %v3007_v11  ;;  %v1511_v60 = vmul.f32 %v1447_v43, %v4244_v48 }
 0x1ca   : > { %v3011_v4 = vpop.eup %3010  ;;  %v1515_v57 = vmul.f32 %v1451_v12, %v4263_v10  ;;  %v1460_v59 = vmul.f32 0.5, %v1396_v21  ;;  %v1455_v42 = vmul.f32 0.5, %v1391_v27  ;;  %v4422_v58 = vrot.slane %v1629_v29, %v313_v51 }
 0x1cb   : > { %2147 = vmatmul.mubr.bf16.gmra.mrb[16].mxu0 %v1551_v61  ;;  %v1459_v14 = vmul.f32 0.5, %v1395_v56  ;;  %v1399_v24 = vadd.f32 1.0, %v3011_v4  ;;  %v1520_v32 = vmul.f32 %v1456_v20, %v4304_v45 }
 0x1cc   : > { %2156 = vmatprep.mubr.bf16.mxu0 %v1556_v8  ;;  %v1555_v30 = vpack.c.bf16 %v1515_v57, %v1511_v60  ;;  %v1524_v28 = vmul.f32 %v1460_v59, %v4320_v54  ;;  %v1519_v1 = vmul.f32 %v1455_v42, %v4299_v44 }
 0x1cd   : > { %v3013_v3 = vpop.eup %3012  ;;  %v1523_v36 = vmul.f32 %v1459_v14, %v4313_v18  ;;  %v1463_v5 = vmul.f32 0.5, %v1399_v24 }
 0x1ce   : > { %v3015_v35 = vpop.eup %3014  ;;  %v1560_v48 = vpack.c.bf16 %v1524_v28, %v1520_v32  ;;  %v1400_v39 = vadd.f32 1.0, %v3013_v3 }
 0x1cf   : > { %v3017_v10 = vpop.eup %3016  ;;  %v1559_v52 = vpack.c.bf16 %v1523_v36, %v1519_v1  ;;  %v1403_v2 = vadd.f32 1.0, %v3015_v35  ;;  %v1527_v45 = vmul.f32 %v1463_v5, %v4351_v15  ;;  %v4427_v15 = vrot.slane %v1629_v29, %v317_v53 }
 0x1d0   : > { %v1404_v17 = vadd.f32 1.0, %v3017_v10  ;;  %v1464_v0 = vmul.f32 0.5, %v1400_v39 }
 0x1d1   : > { %v1467_v23 = vmul.f32 0.5, %v1403_v2 }
 0x1d2   : > { %v1468_v11 = vmul.f32 0.5, %v1404_v17  ;;  %v1528_v18 = vmul.f32 %v1464_v0, %v4362_v49 }
 0x1d3   : > { %2157 = vmatmul.mubr.bf16.gmra.mrb[20].mxu0 %v1555_v30  ;;  %v1531_v44 = vmul.f32 %v1467_v23, %v4366_v38 }
 0x1d4   : > { %2166 = vmatprep.mubr.bf16.mxu0 %v1560_v48  ;;  %v1532_v54 = vmul.f32 %v1468_v11, %v4371_v63 }
 0x1d5   : > { %v1563_v9 = vpack.c.bf16 %v1531_v44, %v1527_v45 }
 0x1d6   : > { %v1564_v13 = vpack.c.bf16 %v1532_v54, %v1528_v18 }
 0x1db   : > { %2167 = vmatmul.mubr.bf16.gmra.mrb[24].mxu0 %v1559_v52 }
 0x1dc   : > { %2176 = vmatprep.mubr.bf16.mxu0 %v1564_v13 }
 0x1e3   : > { %2177 = vmatmul.mubr.bf16.gmra.mrb[28].mxu0 %v1563_v9 }
 0x278   : > { %v2108_v49 = vpop.f32.mrb[0].mxu0 }
 0x279   : > { %v2569_v38 = vadd.f32 %v2108_v49, %v4422_v58  ;;  %v2110_v63 = vpop.f32.mrb[1].mxu0 }
 0x27a   : > { %v2570_v40 = vadd.f32 %v2110_v63, %v4427_v15  ;;  %v2112_v31 = vpop.f32.mrb[2].mxu0 }
 0x27b   : > { %v2571_v37 = vadd.f32 %v2112_v31, %v4422_v58  ;;  %v2114_v55 = vpop.f32.mrb[3].mxu0 }
 0x27c   : > { %v2551_v16 = vpack.c.bf16 %v2570_v40, %v2569_v38  ;;  %v2572_v51 = vadd.f32 %v2114_v55, %v4427_v15 }
 0x27e   : > { %2283 = vst [vmem:[%s4435_s8] sm:$0xff] %v2551_v16  ;;  %v2552_v50 = vpack.c.bf16 %v2572_v51, %v2571_v37 }
 0x280   : > { %2284 = vst [vmem:[%s4435_s8 + $0x8] sm:$0xff] %v2552_v50 }
 0x284   : > { %v2118_v53 = vpop.f32.mrb[4].mxu0 }
 0x285   : > { %v2573_v47 = vadd.f32 %v2118_v53, %v4422_v58  ;;  %v2120_v19 = vpop.f32.mrb[5].mxu0 }
 0x286   : > { %v2574_v46 = vadd.f32 %v2120_v19, %v4427_v15  ;;  %v2122_v34 = vpop.f32.mrb[6].mxu0 }
 0x287   : > { %v2575_v41 = vadd.f32 %v2122_v34, %v4422_v58  ;;  %v2124_v6 = vpop.f32.mrb[7].mxu0 }
 0x288   : > { %v2553_v7 = vpack.c.bf16 %v2574_v46, %v2573_v47  ;;  %v2576_v33 = vadd.f32 %v2124_v6, %v4427_v15 }
 0x28a   : > { %2285 = vst [vmem:[%s4435_s8 + $0x10] sm:$0xff] %v2553_v7  ;;  %v2554_v62 = vpack.c.bf16 %v2576_v33, %v2575_v41 }
 0x28c   : > { %2286 = vst [vmem:[%s4435_s8 + $0x18] sm:$0xff] %v2554_v62 }
 0x28d   : > { %v2128_v25 = vpop.f32.mrb[8].mxu0 }
 0x28e   : > { %v2577_v22 = vadd.f32 %v2128_v25, %v4422_v58  ;;  %v2130_v43 = vpop.f32.mrb[9].mxu0 }
 0x28f   : > { %v2578_v26 = vadd.f32 %v2130_v43, %v4427_v15  ;;  %v2132_v61 = vpop.f32.mrb[10].mxu0 }
 0x290   : > { %v2579_v12 = vadd.f32 %v2132_v61, %v4422_v58  ;;  %v2134_v21 = vpop.f32.mrb[11].mxu0 }
 0x291   : > { %v2555_v27 = vpack.c.bf16 %v2578_v26, %v2577_v22  ;;  %v2580_v8 = vadd.f32 %v2134_v21, %v4427_v15 }
 0x293   : > { %2287 = vst [vmem:[%s4435_s8 + $0x20] sm:$0xff] %v2555_v27  ;;  %v2556_v20 = vpack.c.bf16 %v2580_v8, %v2579_v12 }
 0x295   : > { %2288 = vst [vmem:[%s4435_s8 + $0x28] sm:$0xff] %v2556_v20 }
 0x296   : > { %v2138_v56 = vpop.f32.mrb[12].mxu0 }
 0x297   : > { %v2581_v4 = vadd.f32 %v2138_v56, %v4422_v58  ;;  %v2140_v60 = vpop.f32.mrb[13].mxu0 }
 0x298   : > { %v2582_v57 = vadd.f32 %v2140_v60, %v4427_v15  ;;  %v2142_v59 = vpop.f32.mrb[14].mxu0 }
 0x299   : > { %v2583_v42 = vadd.f32 %v2142_v59, %v4422_v58  ;;  %v2144_v14 = vpop.f32.mrb[15].mxu0 }
 0x29a   : > { %v2557_v24 = vpack.c.bf16 %v2582_v57, %v2581_v4  ;;  %v2584_v30 = vadd.f32 %v2144_v14, %v4427_v15 }
 0x29c   : > { %2289 = vst [vmem:[%s4435_s8 + $0x30] sm:$0xff] %v2557_v24  ;;  %v2558_v32 = vpack.c.bf16 %v2584_v30, %v2583_v42 }
 0x29e   : > { %2290 = vst [vmem:[%s4435_s8 + $0x38] sm:$0xff] %v2558_v32  ;;  %v2148_v28 = vpop.f32.mrb[16].mxu0 }
 0x29f   : > { %v2585_v3 = vadd.f32 %v2148_v28, %v4422_v58  ;;  %v2150_v1 = vpop.f32.mrb[17].mxu0 }
 0x2a0   : > { %v2586_v36 = vadd.f32 %v2150_v1, %v4427_v15  ;;  %v2152_v35 = vpop.f32.mrb[18].mxu0 }
 0x2a1   : > { %v2587_v48 = vadd.f32 %v2152_v35, %v4422_v58  ;;  %v2154_v39 = vpop.f32.mrb[19].mxu0 }
 0x2a2   : > { %v2559_v10 = vpack.c.bf16 %v2586_v36, %v2585_v3  ;;  %v2588_v52 = vadd.f32 %v2154_v39, %v4427_v15 }
 0x2a4   : > { %2291 = vst [vmem:[%s4435_s8 + $0x40] sm:$0xff] %v2559_v10  ;;  %v2560_v2 = vpack.c.bf16 %v2588_v52, %v2587_v48 }
 0x2a6   : > { %2292 = vst [vmem:[%s4435_s8 + $0x48] sm:$0xff] %v2560_v2  ;;  %v2158_v5 = vpop.f32.mrb[20].mxu0 }
 0x2a7   : > { %v2589_v17 = vadd.f32 %v2158_v5, %v4422_v58  ;;  %v2160_v0 = vpop.f32.mrb[21].mxu0 }
 0x2a8   : > { %v2590_v23 = vadd.f32 %v2160_v0, %v4427_v15  ;;  %v2162_v11 = vpop.f32.mrb[22].mxu0 }
 0x2a9   : > { %v2591_v45 = vadd.f32 %v2162_v11, %v4422_v58  ;;  %v2164_v44 = vpop.f32.mrb[23].mxu0 }
 0x2aa   : > { %v2561_v18 = vpack.c.bf16 %v2590_v23, %v2589_v17  ;;  %v2592_v54 = vadd.f32 %v2164_v44, %v4427_v15 }
 0x2ac   : > { %2293 = vst [vmem:[%s4435_s8 + $0x50] sm:$0xff] %v2561_v18  ;;  %v2562_v9 = vpack.c.bf16 %v2592_v54, %v2591_v45 }
 0x2ae   : > { %2294 = vst [vmem:[%s4435_s8 + $0x58] sm:$0xff] %v2562_v9  ;;  %v2168_v13 = vpop.f32.mrb[24].mxu0 }
 0x2af   : > { %v2593_v29 = vadd.f32 %v2168_v13, %v4422_v58  ;;  %v2170_v49 = vpop.f32.mrb[25].mxu0 }
 0x2b0   : > { %v2594_v38 = vadd.f32 %v2170_v49, %v4427_v15  ;;  %v2172_v63 = vpop.f32.mrb[26].mxu0 }
 0x2b1   : > { %v2595_v40 = vadd.f32 %v2172_v63, %v4422_v58  ;;  %v2174_v31 = vpop.f32.mrb[27].mxu0 }
 0x2b2   : > { %v2563_v37 = vpack.c.bf16 %v2594_v38, %v2593_v29  ;;  %v2596_v55 = vadd.f32 %v2174_v31, %v4427_v15 }
 0x2b4   : > { %2295 = vst [vmem:[%s4435_s8 + $0x60] sm:$0xff] %v2563_v37  ;;  %v2564_v16 = vpack.c.bf16 %v2596_v55, %v2595_v40 }
 0x2b6   : > { %2296 = vst [vmem:[%s4435_s8 + $0x68] sm:$0xff] %v2564_v16  ;;  %v2178_v51 = vpop.f32.mrb[28].mxu0 }
 0x2b7   : > { %v2597_v50 = vadd.f32 %v2178_v51, %v4422_v58  ;;  %v2180_v53 = vpop.f32.mrb[29].mxu0 }
 0x2b8   : > { %v2598_v47 = vadd.f32 %v2180_v53, %v4427_v15  ;;  %v2182_v19 = vpop.f32.mrb[30].mxu0 }
 0x2b9   : > { %v2599_v46 = vadd.f32 %v2182_v19, %v4422_v58  ;;  %v2184_v34 = vpop.f32.mrb[31].mxu0 }
 0x2ba   : > { %v2565_v41 = vpack.c.bf16 %v2598_v47, %v2597_v50  ;;  %v2600_v6 = vadd.f32 %v2184_v34, %v4427_v15 }
 0x2bc   : > { %2297 = vst [vmem:[%s4435_s8 + $0x70] sm:$0xff] %v2565_v41  ;;  %v2566_v7 = vpack.c.bf16 %v2600_v6, %v2599_v46 }
 0x2be   : > { %2298 = vst [vmem:[%s4435_s8 + $0x78] sm:$0xff] %v2566_v7 }
 0x2bf   : > { %3031 = shalt.err (!%p3028_p3)
}
 0x2c0   : > { %s3032_s25 = scalar_lea.hbm %s4484_s13, 2048  ;;  %s3036_s30 = scalar_lea.hbm %s4538_s5, 4096 }
 0x2c1   : > { %p3033_p4 = scmp.ne.s32.totalorder %s4484_s13, %s3032_s25  ;;  %p3037_p9 = scmp.lt.u32.totalorder %s4484_s13, %s4538_s5 }
 0x2c2   : > { %p3038_p10 = scmp.lt.u32.totalorder %s3036_s30, %s3032_s25  ;;  %p3040_p12 = scmp.lt.u32.totalorder %s3032_s25, %s4484_s13 }
 0x2c3   : > { %p3034_p7 = pnand %p3033_p4, %p3153_p5 }
 0x2c4   : > { %p3039_p11 = por %p3038_p10, %p3037_p9 }
 0x2c5   : > { %p3035_p8 = pneg %p3034_p7 }
 0x2c6   : > { %p3041_p13 = por %p3040_p12, %p3039_p11 }
 0x2c8   : > { %p3042_p0 = pnand %p3041_p13, %p3035_p8 }
 0x2ca   : > { %3045 = shalt.err (!%p3042_p0)
}
 0x2cb   : > { %s3083_s8 = smov 128   ;;  %s3084_s9 = smov 8  }
 0x2cc   : > { %2633 = dma.vmem_to_hbm [thread:$0]  (%p3153_p5), %s4486_s10, 2048, %s4484_s13, %s4492_s22, %s3083_s8, %s3083_s8, %s3084_s9  }
 0x2cd PF: > { %p2639_p1 = scmp.ge.s32.totalorder %s3080_s21, 2  ;;  %s2329_s11 = sand.u32 1, %s3068_s18  }
 0x2ce   : > { %s2330_s12 = scalar_lea.sflag [#allocation3], %s2329_s11 }
 0x2cf   : > { %p2636_p2 = pnand %p2639_p1, %p3157_p6 }
 0x2d1   : > { %3063 = dma.done.wait (!%p2636_p2), %s2330_s12, 2048  }
 0x2d2   : > { %3065 = vsyncadd (!%p2636_p2), %s2330_s12, 4294965248  ;;  %p15_p3 = scmp.ge.s32.totalorder %s3140_s24, 4   ;;  %s4541_s18 = smov %s3072_s19 }
 0x2d3   : > { %s4542_s19 = smov %s3076_s20  ;;  %s4543_s20 = smov %s3151_s27 }
 0x2d4   : > { %s4544_s21 = smov %s3140_s24  ;;  %17 = sbr.rel (!%p15_p3) target bundleno = 3 (0x3), region = 75 }
 0x2db   :  { %2335 = vsyncpa [#allocation3], 1 }
 0x2dc   :  { %2337 = vsyncpa [#allocation3 + $0x1], 1 }

</bundles_post_ra>
